<compile_context>
chip_gen: v7x
topology: tpu7x:2x2x1
jax: 0.10.0
libtpu: 0.0.40
codegen_flags: <defaults>
</compile_context>

<pallas_src>
import math

import jax
import jax.numpy as jnp
import numpy as np
from jax.experimental import pallas as pl
from jax.experimental.pallas import tpu as pltpu


# --------------------------- shared math helpers ---------------------------- #
def _mdot(a, b):
    """MXU matmul: bf16 operands, f32 accumulation (a's last dim vs b's first)."""
    return jnp.dot(a.astype(jnp.bfloat16), b.astype(jnp.bfloat16),
                   preferred_element_type=jnp.float32)


def _mdot_t(a, b):
    """MXU matmul contracting the LAST dim of both 2-D operands (q @ k^T)."""
    return jax.lax.dot_general(
        a.astype(jnp.bfloat16), b.astype(jnp.bfloat16),
        dimension_numbers=(((1,), (1,)), ((), ())),
        preferred_element_type=jnp.float32)


def _layer_norm(v, g, b, eps=1e-5):
    mu = jnp.mean(v, axis=-1, keepdims=True)
    var = jnp.mean(jnp.square(v - mu), axis=-1, keepdims=True)
    return (v - mu) * jax.lax.rsqrt(var + eps) * g + b


def _softmax_last(s):
    s = s - jnp.max(s, axis=-1, keepdims=True)
    e = jnp.exp(s)
    return e / jnp.sum(e, axis=-1, keepdims=True)


def _softmax_last_fast(s):
    """In-kernel softmax: denominator via the EUP approximate reciprocal."""
    s = s - jnp.max(s, axis=-1, keepdims=True)
    e = jnp.exp(s)
    return e * pl.reciprocal(jnp.sum(e, axis=-1, keepdims=True), approx=True)


# ------------------------------ Pallas kernel -------------------------------- #
PARAM_ORDER = ("w_emb", "b_emb", "w_q", "b_q", "w_k", "b_k", "w_v", "b_v",
               "w_o", "b_o", "ln1_w", "ln1_b", "w_ff1", "b_ff1",
               "w_ff2", "b_ff2", "ln2_w", "ln2_b", "w_fc", "b_fc")
# Layer-independent params stay resident in VMEM; everything else is streamed
# per transformer layer over the inner ("arbitrary") grid axis.
_RESIDENT = frozenset({"w_emb", "b_emb", "w_fc", "b_fc"})


def _make_kernel(num_heads, seq_len):
    def kernel(x_ref, w_emb_ref, b_emb_ref,
               w_q_ref, b_q_ref, w_k_ref, b_k_ref, w_v_ref, b_v_ref,
               w_o_ref, b_o_ref, ln1_w_ref, ln1_b_ref,
               w_ff1_ref, b_ff1_ref, w_ff2_ref, b_ff2_ref,
               ln2_w_ref, ln2_b_ref, w_fc_ref, b_fc_ref,
               out_ref, h_ref):
        """Grid = (batch blocks, transformer layers).

        x_ref/out_ref : (R, I) row slab, R = batch_block * seq_len
        w_q/k/v/o     : (1, H, H) per-layer fused projections (bf16, streamed)
        w_ff1/w_ff2   : (1, H, FF) / (1, FF, H) per-layer FF weights (bf16)
        biases / LN   : (1, 1, dim) per-layer, float32
        h_ref         : (R, H) f32 VMEM scratch carried across the layer axis
        """
        l = pl.program_id(1)
        R = x_ref.shape[0]
        H = w_emb_ref.shape[1]
        dh = H // num_heads
        bb = R // seq_len
        scale = 1.0 / math.sqrt(dh)
        bf16 = jnp.bfloat16

        # ---- embedding: only on the first layer step of this batch block ----
        @pl.when(l == 0)
        def _embed():
            h_ref[...] = _mdot(x_ref[...], w_emb_ref[...]) + b_emb_ref[...]

        h = h_ref[...]                                    # (R, H) f32
        h_bf = h.astype(bf16)                             # hoisted cast, reused 3x

        # ---- multi-head self-attention: fused full-width QKV projections ----
        q = _mdot(h_bf, w_q_ref[0]) + b_q_ref[0]          # (R, H) f32
        k = _mdot(h_bf, w_k_ref[0]) + b_k_ref[0]
        v = _mdot(h_bf, w_v_ref[0]) + b_v_ref[0]

        # Per-(batch element, head) attention core; context reassembled
        # lane-dense so the output projection is a single (R,H)@(H,H) matmul.
        ctx_rows = []
        for b in range(bb):                               # static unroll
            r0 = b * seq_len
            q_b = q[r0:r0 + seq_len]
            k_b = k[r0:r0 + seq_len]
            v_b = v[r0:r0 + seq_len]
            head_ctx = []
            for n in range(num_heads):                    # static unroll
                c0 = n * dh
                qn = q_b[:, c0:c0 + dh]                   # (S, dh)
                kn = k_b[:, c0:c0 + dh]
                vn = v_b[:, c0:c0 + dh]
                s = _mdot_t(qn, kn) * scale               # (S, S) f32
                p = _softmax_last_fast(s)                 # (S, S) f32
                head_ctx.append(_mdot(p, vn))             # (S, dh)
            ctx_rows.append(jnp.concatenate(head_ctx, axis=-1))   # (S, H)
        ctx = jnp.concatenate(ctx_rows, axis=0)           # (R, H)

        attn = _mdot(ctx, w_o_ref[0]) + b_o_ref[0]        # single fused out-proj
        h = _layer_norm(h + attn, ln1_w_ref[0], ln1_b_ref[0])

        # ---- feed-forward: linear -> relu -> linear ----
        ff = jnp.maximum(_mdot(h, w_ff1_ref[0]) + b_ff1_ref[0], 0.0)   # (R, FF)
        ff = ff.astype(bf16)                              # widest live tensor in bf16
        ff = _mdot(ff, w_ff2_ref[0]) + b_ff2_ref[0]       # (R, H) f32
        h = _layer_norm(h + ff, ln2_w_ref[0], ln2_b_ref[0])
        h_ref[...] = h

        # ---- final projection: only on the last layer step ----
        @pl.when(l == pl.num_programs(1) - 1)
        def _project():
            out = _mdot(h, w_fc_ref[...]) + b_fc_ref[...]              # (R, I)
            out_ref[...] = out.astype(out_ref.dtype)

    return kernel


def _default_batch_block(B):
    """Whole batch per grid step on single-TC chips (v5e/v6e); 2-way batch
    split on multi-TC chips (v7x) so both TensorCores get work."""
    try:
        kind = jax.devices()[0].device_kind.lower()
    except Exception:
        kind = ""
    multi_tc = ("v7" in kind) or ("7x" in kind)
    if multi_tc and B >= 2 and B % 2 == 0:
        return B // 2
    return B


def transformer_forward(params, x, *, num_heads=4, batch_block=None):
    """Forward pass equivalent to Transformer.forward; x: [B, S, input_size]."""
    B, S, I = x.shape
    H = params["w_emb"].shape[1]
    TL = params["w_q"].shape[0]          # 2*num_layers (encoder + decoder stacks)
    FF = params["w_ff1"].shape[2]
    x = x.astype(jnp.float32)

    if batch_block is None:
        batch_block = _default_batch_block(B)
    if B % batch_block != 0:
        batch_block = B
    nb = B // batch_block
    rows = batch_block * S

    weights = [jnp.asarray(params[name]) for name in PARAM_ORDER]
    x_rows = x.reshape(B * S, I)          # free wrapper-side reshape (row-major)

    def resident_spec(arr):
        zeros = (0,) * arr.ndim
        return pl.BlockSpec(arr.shape, lambda b, l: zeros)         # VMEM-resident

    def layer_spec(arr):
        tail = (0,) * (arr.ndim - 1)
        return pl.BlockSpec((1,) + arr.shape[1:], lambda b, l: (l,) + tail)

    in_specs = [pl.BlockSpec((rows, I), lambda b, l: (b, 0))]
    for name, arr in zip(PARAM_ORDER, weights):
        in_specs.append(resident_spec(arr) if name in _RESIDENT else layer_spec(arr))

    # Advisory cost estimate so XLA schedules around the fused custom call.
    flops_layer = (4 * 2 * S * H * H       # fused q, k, v, output projections
                   + 2 * 2 * S * S * H     # scores and context (summed over heads)
                   + 2 * 2 * S * H * FF)   # feed-forward
    flops = B * (2 * S * I * H + TL * flops_layer + 2 * S * H * I)
    transcendentals = B * TL * (num_heads * S * S + num_heads * S)
    bytes_accessed = int(
        x.size * 4 + B * S * I * 4
        + nb * sum(int(np.prod(w.shape)) * w.dtype.itemsize for w in weights))

    out_rows = pl.pallas_call(
        _make_kernel(num_heads, S),
        out_shape=jax.ShapeDtypeStruct((B * S, I), jnp.float32),
        grid_spec=pltpu.PrefetchScalarGridSpec(
            num_scalar_prefetch=0,
            grid=(nb, TL),                 # batch blocks x transformer layers
            in_specs=in_specs,
            out_specs=pl.BlockSpec((rows, I), lambda b, l: (b, 0)),
            scratch_shapes=[pltpu.VMEM((rows, H), jnp.float32)]),
        compiler_params=pltpu.CompilerParams(
            dimension_semantics=("parallel", "arbitrary")),
        cost_estimate=pl.CostEstimate(
            flops=int(flops),
            transcendentals=int(transcendentals),
            bytes_accessed=bytes_accessed),
    )(x_rows, *weights)
    return out_rows.reshape(B, S, I)


# ------------------------------- Parameters ---------------------------------- #
def init_transformer_params(key, input_size, hidden_size, num_layers, num_heads, ff_dim):
    """Deterministic params. Matrices are bf16 (MXU operands), biases/LN are f32.

    Attention projections are stored fused: w_q/w_k/w_v/w_o are (TL, H, H) with
    head n occupying columns (rows for w_o) n*dh:(n+1)*dh.
    """
    del num_heads  # layout is head-fused; the split happens inside the kernel
    TL = 2 * num_layers                   # encoder stack + decoder stack
    keys = iter(jax.random.split(key, 32))

    def unif(shape, bound, dtype=jnp.float32):
        return jax.random.uniform(next(keys), shape, jnp.float32,
                                  -bound, bound).astype(dtype)

    bi = 1.0 / math.sqrt(input_size)
    bh = 1.0 / math.sqrt(hidden_size)
    bf = 1.0 / math.sqrt(ff_dim)
    return {
        "w_emb": unif((input_size, hidden_size), bi, jnp.bfloat16),
        "b_emb": unif((1, hidden_size), bi),
        "w_q": unif((TL, hidden_size, hidden_size), bh, jnp.bfloat16),
        "b_q": unif((TL, 1, hidden_size), bh),
        "w_k": unif((TL, hidden_size, hidden_size), bh, jnp.bfloat16),
        "b_k": unif((TL, 1, hidden_size), bh),
        "w_v": unif((TL, hidden_size, hidden_size), bh, jnp.bfloat16),
        "b_v": unif((TL, 1, hidden_size), bh),
        "w_o": unif((TL, hidden_size, hidden_size), bh, jnp.bfloat16),
        "b_o": unif((TL, 1, hidden_size), bh),
        "ln1_w": jnp.ones((TL, 1, hidden_size), jnp.float32),
        "ln1_b": jnp.zeros((TL, 1, hidden_size), jnp.float32),
        "w_ff1": unif((TL, hidden_size, ff_dim), bh, jnp.bfloat16),
        "b_ff1": unif((TL, 1, ff_dim), bh),
        "w_ff2": unif((TL, ff_dim, hidden_size), bf, jnp.bfloat16),
        "b_ff2": unif((TL, 1, hidden_size), bf),
        "ln2_w": jnp.ones((TL, 1, hidden_size), jnp.float32),
        "ln2_b": jnp.zeros((TL, 1, hidden_size), jnp.float32),
        "w_fc": unif((hidden_size, input_size), bh, jnp.bfloat16),
        "b_fc": unif((1, input_size), bh),
    }


# ---------------------------- Pure-JAX reference ------------------------------ #
def transformer_forward_ref(params, x, num_heads=4):
    bf16, f32 = jnp.bfloat16, jnp.float32
    x = x.astype(f32)
    B, S, I = x.shape
    TL = params["w_q"].shape[0]
    H = params["w_emb"].shape[1]
    dh = H // num_heads
    scale = 1.0 / math.sqrt(dh)

    h = _mdot(x, params["w_emb"]) + params["b_emb"]                   # (B, S, H)
    for l in range(TL):
        h_bf = h.astype(bf16)
        q = _mdot(h_bf, params["w_q"][l]) + params["b_q"][l]          # (B, S, H)
        k = _mdot(h_bf, params["w_k"][l]) + params["b_k"][l]
        v = _mdot(h_bf, params["w_v"][l]) + params["b_v"][l]
        qh = q.reshape(B, S, num_heads, dh)
        kh = k.reshape(B, S, num_heads, dh)
        vh = v.reshape(B, S, num_heads, dh)
        s = jnp.einsum("bqnd,bknd->bnqk", qh.astype(bf16), kh.astype(bf16),
                       preferred_element_type=f32) * scale
        p = _softmax_last(s)
        ctx = jnp.einsum("bnqk,bknd->bqnd", p.astype(bf16), vh.astype(bf16),
                         preferred_element_type=f32).reshape(B, S, H)
        attn = _mdot(ctx, params["w_o"][l]) + params["b_o"][l]
        h = _layer_norm(h + attn, params["ln1_w"][l], params["ln1_b"][l])

        ff = jnp.maximum(_mdot(h, params["w_ff1"][l]) + params["b_ff1"][l], 0.0)
        ff = _mdot(ff, params["w_ff2"][l]) + params["b_ff2"][l]
        h = _layer_norm(h + ff, params["ln2_w"][l], params["ln2_b"][l])

    return _mdot(h, params["w_fc"]) + params["b_fc"]


# ------------------------------------ Main ------------------------------------ #
if __name__ == "__main__":
    INPUT_SIZE, HIDDEN_SIZE, NUM_LAYERS = 16, 32, 2
    NUM_HEADS, FF_DIM = 4, 2048          # TransformerEncoderLayer(nhead=4) defaults
    B, S = 2, 8

    key = jax.random.PRNGKey(0)
    k_params, k_x = jax.random.split(key)
    params = init_transformer_params(k_params, INPUT_SIZE, HIDDEN_SIZE,
                                     NUM_LAYERS, NUM_HEADS, FF_DIM)
    x = jax.random.normal(k_x, (B, S, INPUT_SIZE), jnp.float32)

    out = jax.block_until_ready(transformer_forward(params, x, num_heads=NUM_HEADS))
    ref = jax.block_until_ready(transformer_forward_ref(params, x, num_heads=NUM_HEADS))

    assert out.shape == (B, S, INPUT_SIZE), out.shape
    # bf16 MXU discipline + EUP approximate reciprocal in the kernel softmax.
    np.testing.assert_allclose(np.asarray(out), np.asarray(ref), rtol=1e-2, atol=1e-2)

    print("KERNEL_OK")
</pallas_src>

<mosaic_0001>
module attributes {stable_mosaic.version = 11 : i64} {
  func.func @kernel(%arg0: i32, %arg1: i32, %arg2: memref<16x16xf32, #tpu.memory_space<vmem>>, %arg3: memref<16x32xbf16, #tpu.memory_space<vmem>>, %arg4: memref<1x32xf32, #tpu.memory_space<vmem>>, %arg5: memref<1x32x32xbf16, #tpu.memory_space<vmem>>, %arg6: memref<1x1x32xf32, #tpu.memory_space<vmem>>, %arg7: memref<1x32x32xbf16, #tpu.memory_space<vmem>>, %arg8: memref<1x1x32xf32, #tpu.memory_space<vmem>>, %arg9: memref<1x32x32xbf16, #tpu.memory_space<vmem>>, %arg10: memref<1x1x32xf32, #tpu.memory_space<vmem>>, %arg11: memref<1x32x32xbf16, #tpu.memory_space<vmem>>, %arg12: memref<1x1x32xf32, #tpu.memory_space<vmem>>, %arg13: memref<1x1x32xf32, #tpu.memory_space<vmem>>, %arg14: memref<1x1x32xf32, #tpu.memory_space<vmem>>, %arg15: memref<1x32x2048xbf16, #tpu.memory_space<vmem>>, %arg16: memref<1x1x2048xf32, #tpu.memory_space<vmem>>, %arg17: memref<1x2048x32xbf16, #tpu.memory_space<vmem>>, %arg18: memref<1x1x32xf32, #tpu.memory_space<vmem>>, %arg19: memref<1x1x32xf32, #tpu.memory_space<vmem>>, %arg20: memref<1x1x32xf32, #tpu.memory_space<vmem>>, %arg21: memref<32x16xbf16, #tpu.memory_space<vmem>>, %arg22: memref<1x16xf32, #tpu.memory_space<vmem>>, %arg23: memref<16x16xf32, #tpu.memory_space<vmem>>, %arg24: memref<16x32xf32, #tpu.memory_space<vmem>>) attributes {dimension_semantics = [#tpu.dimension_semantics<parallel>, #tpu.dimension_semantics<arbitrary>], iteration_bounds = array<i64: 1, 4>, scalar_prefetch = 0 : i64, scratch_operands = 1 : i64, tpu.core_type = #tpu.core_type<tc>, window_params = [{transform_indices = @transform_0, window_bounds = array<i64: 16, 16>}, {pipeline_mode = #tpu.pipeline_mode<synchronous>, transform_indices = @transform_1, window_bounds = array<i64: 16, 32>}, {pipeline_mode = #tpu.pipeline_mode<synchronous>, transform_indices = @transform_2, window_bounds = array<i64: 1, 32>}, {transform_indices = @transform_3, window_bounds = array<i64: 1, 32, 32>}, {transform_indices = @transform_4, window_bounds = array<i64: 1, 1, 32>}, {transform_indices = @transform_5, window_bounds = array<i64: 1, 32, 32>}, {transform_indices = @transform_6, window_bounds = array<i64: 1, 1, 32>}, {transform_indices = @transform_7, window_bounds = array<i64: 1, 32, 32>}, {transform_indices = @transform_8, window_bounds = array<i64: 1, 1, 32>}, {transform_indices = @transform_9, window_bounds = array<i64: 1, 32, 32>}, {transform_indices = @transform_10, window_bounds = array<i64: 1, 1, 32>}, {transform_indices = @transform_11, window_bounds = array<i64: 1, 1, 32>}, {transform_indices = @transform_12, window_bounds = array<i64: 1, 1, 32>}, {transform_indices = @transform_13, window_bounds = array<i64: 1, 32, 2048>}, {transform_indices = @transform_14, window_bounds = array<i64: 1, 1, 2048>}, {transform_indices = @transform_15, window_bounds = array<i64: 1, 2048, 32>}, {transform_indices = @transform_16, window_bounds = array<i64: 1, 1, 32>}, {transform_indices = @transform_17, window_bounds = array<i64: 1, 1, 32>}, {transform_indices = @transform_18, window_bounds = array<i64: 1, 1, 32>}, {pipeline_mode = #tpu.pipeline_mode<synchronous>, transform_indices = @transform_19, window_bounds = array<i64: 32, 16>}, {pipeline_mode = #tpu.pipeline_mode<synchronous>, transform_indices = @transform_20, window_bounds = array<i64: 1, 16>}, {transform_indices = @transform_21, window_bounds = array<i64: 16, 16>}]} {
    %c0_i32 = arith.constant 0 : i32
    %0 = arith.cmpi eq, %arg1, %c0_i32 : i32
    %1 = arith.extui %0 : i1 to i32
    %c0_i32_0 = arith.constant 0 : i32
    %2 = arith.cmpi ne, %1, %c0_i32_0 : i32
    scf.if %2 {
      %c0_109 = arith.constant 0 : index
      %c0_110 = arith.constant 0 : index
      %287 = vector.load %arg2[%c0_109, %c0_110] : memref<16x16xf32, #tpu.memory_space<vmem>>, vector<16x16xf32>
      %c0_111 = arith.constant 0 : index
      %c0_112 = arith.constant 0 : index
      %288 = vector.load %arg3[%c0_111, %c0_112] : memref<16x32xbf16, #tpu.memory_space<vmem>>, vector<16x32xbf16>
      %289 = arith.truncf %287 : vector<16x16xf32> to vector<16x16xbf16>
      %cst_113 = arith.constant dense<0.000000e+00> : vector<16x32xf32>
      %290 = tpu.matmul %289, %288, %cst_113 {dimension_numbers = #tpu.dot_dimension_numbers<[1], [0], [0], [1], [0, 0, 1, 1], [], []>} : vector<16x16xbf16>, vector<16x32xbf16>, vector<16x32xf32> -> vector<16x32xf32>
      %c0_114 = arith.constant 0 : index
      %c0_115 = arith.constant 0 : index
      %291 = vector.load %arg4[%c0_114, %c0_115] : memref<1x32xf32, #tpu.memory_space<vmem>>, vector<1x32xf32>
      %292 = vector.broadcast %291 : vector<1x32xf32> to vector<16x32xf32>
      %293 = arith.addf %290, %292 : vector<16x32xf32>
      %c0_116 = arith.constant 0 : index
      %c0_117 = arith.constant 0 : index
      %294 = vector.load %arg24[%c0_116, %c0_117] : memref<16x32xf32, #tpu.memory_space<vmem>>, vector<16x32xf32>
      tpu.vector_store %arg24[%c0_116, %c0_117], %293 {strides = array<i32>} : memref<16x32xf32, #tpu.memory_space<vmem>>, vector<16x32xf32>,
    } else {
    }
    %c0 = arith.constant 0 : index
    %c0_1 = arith.constant 0 : index
    %3 = vector.load %arg24[%c0, %c0_1] : memref<16x32xf32, #tpu.memory_space<vmem>>, vector<16x32xf32>
    %4 = arith.truncf %3 : vector<16x32xf32> to vector<16x32xbf16>
    %c0_2 = arith.constant 0 : index
    %c0_3 = arith.constant 0 : index
    %c0_4 = arith.constant 0 : index
    %5 = vector.load %arg5[%c0_2, %c0_3, %c0_4] : memref<1x32x32xbf16, #tpu.memory_space<vmem>>, vector<1x32x32xbf16>
    %6 = vector.shape_cast %5 : vector<1x32x32xbf16> to vector<32x32xbf16>
    %cst = arith.constant dense<0.000000e+00> : vector<16x32xf32>
    %7 = tpu.matmul %4, %6, %cst {dimension_numbers = #tpu.dot_dimension_numbers<[1], [0], [0], [1], [0, 0, 1, 1], [], []>} : vector<16x32xbf16>, vector<32x32xbf16>, vector<16x32xf32> -> vector<16x32xf32>
    %c0_5 = arith.constant 0 : index
    %c0_6 = arith.constant 0 : index
    %c0_7 = arith.constant 0 : index
    %8 = vector.load %arg6[%c0_5, %c0_6, %c0_7] : memref<1x1x32xf32, #tpu.memory_space<vmem>>, vector<1x1x32xf32>
    %9 = vector.shape_cast %8 : vector<1x1x32xf32> to vector<1x32xf32>
    %10 = vector.broadcast %9 : vector<1x32xf32> to vector<16x32xf32>
    %11 = arith.addf %7, %10 : vector<16x32xf32>
    %c0_8 = arith.constant 0 : index
    %c0_9 = arith.constant 0 : index
    %c0_10 = arith.constant 0 : index
    %12 = vector.load %arg7[%c0_8, %c0_9, %c0_10] : memref<1x32x32xbf16, #tpu.memory_space<vmem>>, vector<1x32x32xbf16>
    %13 = vector.shape_cast %12 : vector<1x32x32xbf16> to vector<32x32xbf16>
    %cst_11 = arith.constant dense<0.000000e+00> : vector<16x32xf32>
    %14 = tpu.matmul %4, %13, %cst_11 {dimension_numbers = #tpu.dot_dimension_numbers<[1], [0], [0], [1], [0, 0, 1, 1], [], []>} : vector<16x32xbf16>, vector<32x32xbf16>, vector<16x32xf32> -> vector<16x32xf32>
    %c0_12 = arith.constant 0 : index
    %c0_13 = arith.constant 0 : index
    %c0_14 = arith.constant 0 : index
    %15 = vector.load %arg8[%c0_12, %c0_13, %c0_14] : memref<1x1x32xf32, #tpu.memory_space<vmem>>, vector<1x1x32xf32>
    %16 = vector.shape_cast %15 : vector<1x1x32xf32> to vector<1x32xf32>
    %17 = vector.broadcast %16 : vector<1x32xf32> to vector<16x32xf32>
    %18 = arith.addf %14, %17 : vector<16x32xf32>
    %c0_15 = arith.constant 0 : index
    %c0_16 = arith.constant 0 : index
    %c0_17 = arith.constant 0 : index
    %19 = vector.load %arg9[%c0_15, %c0_16, %c0_17] : memref<1x32x32xbf16, #tpu.memory_space<vmem>>, vector<1x32x32xbf16>
    %20 = vector.shape_cast %19 : vector<1x32x32xbf16> to vector<32x32xbf16>
    %cst_18 = arith.constant dense<0.000000e+00> : vector<16x32xf32>
    %21 = tpu.matmul %4, %20, %cst_18 {dimension_numbers = #tpu.dot_dimension_numbers<[1], [0], [0], [1], [0, 0, 1, 1], [], []>} : vector<16x32xbf16>, vector<32x32xbf16>, vector<16x32xf32> -> vector<16x32xf32>
    %c0_19 = arith.constant 0 : index
    %c0_20 = arith.constant 0 : index
    %c0_21 = arith.constant 0 : index
    %22 = vector.load %arg10[%c0_19, %c0_20, %c0_21] : memref<1x1x32xf32, #tpu.memory_space<vmem>>, vector<1x1x32xf32>
    %23 = vector.shape_cast %22 : vector<1x1x32xf32> to vector<1x32xf32>
    %24 = vector.broadcast %23 : vector<1x32xf32> to vector<16x32xf32>
    %25 = arith.addf %21, %24 : vector<16x32xf32>
    %26 = vector.extract_strided_slice %11 {offsets = [0, 0], sizes = [8, 32], strides = [1, 1]} : vector<16x32xf32> to vector<8x32xf32>
    %27 = vector.extract_strided_slice %18 {offsets = [0, 0], sizes = [8, 32], strides = [1, 1]} : vector<16x32xf32> to vector<8x32xf32>
    %28 = vector.extract_strided_slice %25 {offsets = [0, 0], sizes = [8, 32], strides = [1, 1]} : vector<16x32xf32> to vector<8x32xf32>
    %29 = vector.extract_strided_slice %26 {offsets = [0, 0], sizes = [8, 8], strides = [1, 1]} : vector<8x32xf32> to vector<8x8xf32>
    %30 = vector.extract_strided_slice %27 {offsets = [0, 0], sizes = [8, 8], strides = [1, 1]} : vector<8x32xf32> to vector<8x8xf32>
    %31 = vector.extract_strided_slice %28 {offsets = [0, 0], sizes = [8, 8], strides = [1, 1]} : vector<8x32xf32> to vector<8x8xf32>
    %32 = arith.truncf %29 : vector<8x8xf32> to vector<8x8xbf16>
    %33 = arith.truncf %30 : vector<8x8xf32> to vector<8x8xbf16>
    %cst_22 = arith.constant dense<0.000000e+00> : vector<8x8xf32>
    %34 = tpu.matmul %32, %33, %cst_22 {dimension_numbers = #tpu.dot_dimension_numbers<[1], [1], [0], [0], [0, 0, 1, 0], [], []>} : vector<8x8xbf16>, vector<8x8xbf16>, vector<8x8xf32> -> vector<8x8xf32>
    %cst_23 = arith.constant 0.353553385 : f32
    %35 = vector.broadcast %cst_23 : f32 to vector<8x8xf32>
    %36 = arith.mulf %34, %35 : vector<8x8xf32>
    %cst_24 = arith.constant dense<0xFF800000> : vector<8xf32>
    %37 = vector.multi_reduction <maximumf>, %36, %cst_24 [1] : vector<8x8xf32> to vector<8xf32>
    %38 = vector.shape_cast %37 : vector<8xf32> to vector<8x1xf32>
    %39 = vector.broadcast %38 : vector<8x1xf32> to vector<8x8xf32>
    %40 = arith.subf %36, %39 : vector<8x8xf32>
    %41 = math.exp %40 : vector<8x8xf32>
    %cst_25 = arith.constant dense<0.000000e+00> : vector<8xf32>
    %42 = vector.multi_reduction <add>, %41, %cst_25 [1] : vector<8x8xf32> to vector<8xf32>
    %43 = vector.shape_cast %42 : vector<8xf32> to vector<8x1xf32>
    %44 = tpu.reciprocal %43 {approx = true} : vector<8x1xf32> -> vector<8x1xf32>
    %45 = vector.broadcast %44 : vector<8x1xf32> to vector<8x8xf32>
    %46 = arith.mulf %41, %45 : vector<8x8xf32>
    %47 = arith.truncf %46 : vector<8x8xf32> to vector<8x8xbf16>
    %48 = arith.truncf %31 : vector<8x8xf32> to vector<8x8xbf16>
    %cst_26 = arith.constant dense<0.000000e+00> : vector<8x8xf32>
    %49 = tpu.matmul %47, %48, %cst_26 {dimension_numbers = #tpu.dot_dimension_numbers<[1], [0], [0], [1], [0, 0, 1, 1], [], []>} : vector<8x8xbf16>, vector<8x8xbf16>, vector<8x8xf32> -> vector<8x8xf32>
    %50 = vector.extract_strided_slice %26 {offsets = [0, 8], sizes = [8, 8], strides = [1, 1]} : vector<8x32xf32> to vector<8x8xf32>
    %51 = vector.extract_strided_slice %27 {offsets = [0, 8], sizes = [8, 8], strides = [1, 1]} : vector<8x32xf32> to vector<8x8xf32>
    %52 = vector.extract_strided_slice %28 {offsets = [0, 8], sizes = [8, 8], strides = [1, 1]} : vector<8x32xf32> to vector<8x8xf32>
    %53 = arith.truncf %50 : vector<8x8xf32> to vector<8x8xbf16>
    %54 = arith.truncf %51 : vector<8x8xf32> to vector<8x8xbf16>
    %cst_27 = arith.constant dense<0.000000e+00> : vector<8x8xf32>
    %55 = tpu.matmul %53, %54, %cst_27 {dimension_numbers = #tpu.dot_dimension_numbers<[1], [1], [0], [0], [0, 0, 1, 0], [], []>} : vector<8x8xbf16>, vector<8x8xbf16>, vector<8x8xf32> -> vector<8x8xf32>
    %cst_28 = arith.constant 0.353553385 : f32
    %56 = vector.broadcast %cst_28 : f32 to vector<8x8xf32>
    %57 = arith.mulf %55, %56 : vector<8x8xf32>
    %cst_29 = arith.constant dense<0xFF800000> : vector<8xf32>
    %58 = vector.multi_reduction <maximumf>, %57, %cst_29 [1] : vector<8x8xf32> to vector<8xf32>
    %59 = vector.shape_cast %58 : vector<8xf32> to vector<8x1xf32>
    %60 = vector.broadcast %59 : vector<8x1xf32> to vector<8x8xf32>
    %61 = arith.subf %57, %60 : vector<8x8xf32>
    %62 = math.exp %61 : vector<8x8xf32>
    %cst_30 = arith.constant dense<0.000000e+00> : vector<8xf32>
    %63 = vector.multi_reduction <add>, %62, %cst_30 [1] : vector<8x8xf32> to vector<8xf32>
    %64 = vector.shape_cast %63 : vector<8xf32> to vector<8x1xf32>
    %65 = tpu.reciprocal %64 {approx = true} : vector<8x1xf32> -> vector<8x1xf32>
    %66 = vector.broadcast %65 : vector<8x1xf32> to vector<8x8xf32>
    %67 = arith.mulf %62, %66 : vector<8x8xf32>
    %68 = arith.truncf %67 : vector<8x8xf32> to vector<8x8xbf16>
    %69 = arith.truncf %52 : vector<8x8xf32> to vector<8x8xbf16>
    %cst_31 = arith.constant dense<0.000000e+00> : vector<8x8xf32>
    %70 = tpu.matmul %68, %69, %cst_31 {dimension_numbers = #tpu.dot_dimension_numbers<[1], [0], [0], [1], [0, 0, 1, 1], [], []>} : vector<8x8xbf16>, vector<8x8xbf16>, vector<8x8xf32> -> vector<8x8xf32>
    %71 = vector.extract_strided_slice %26 {offsets = [0, 16], sizes = [8, 8], strides = [1, 1]} : vector<8x32xf32> to vector<8x8xf32>
    %72 = vector.extract_strided_slice %27 {offsets = [0, 16], sizes = [8, 8], strides = [1, 1]} : vector<8x32xf32> to vector<8x8xf32>
    %73 = vector.extract_strided_slice %28 {offsets = [0, 16], sizes = [8, 8], strides = [1, 1]} : vector<8x32xf32> to vector<8x8xf32>
    %74 = arith.truncf %71 : vector<8x8xf32> to vector<8x8xbf16>
    %75 = arith.truncf %72 : vector<8x8xf32> to vector<8x8xbf16>
    %cst_32 = arith.constant dense<0.000000e+00> : vector<8x8xf32>
    %76 = tpu.matmul %74, %75, %cst_32 {dimension_numbers = #tpu.dot_dimension_numbers<[1], [1], [0], [0], [0, 0, 1, 0], [], []>} : vector<8x8xbf16>, vector<8x8xbf16>, vector<8x8xf32> -> vector<8x8xf32>
    %cst_33 = arith.constant 0.353553385 : f32
    %77 = vector.broadcast %cst_33 : f32 to vector<8x8xf32>
    %78 = arith.mulf %76, %77 : vector<8x8xf32>
    %cst_34 = arith.constant dense<0xFF800000> : vector<8xf32>
    %79 = vector.multi_reduction <maximumf>, %78, %cst_34 [1] : vector<8x8xf32> to vector<8xf32>
    %80 = vector.shape_cast %79 : vector<8xf32> to vector<8x1xf32>
    %81 = vector.broadcast %80 : vector<8x1xf32> to vector<8x8xf32>
    %82 = arith.subf %78, %81 : vector<8x8xf32>
    %83 = math.exp %82 : vector<8x8xf32>
    %cst_35 = arith.constant dense<0.000000e+00> : vector<8xf32>
    %84 = vector.multi_reduction <add>, %83, %cst_35 [1] : vector<8x8xf32> to vector<8xf32>
    %85 = vector.shape_cast %84 : vector<8xf32> to vector<8x1xf32>
    %86 = tpu.reciprocal %85 {approx = true} : vector<8x1xf32> -> vector<8x1xf32>
    %87 = vector.broadcast %86 : vector<8x1xf32> to vector<8x8xf32>
    %88 = arith.mulf %83, %87 : vector<8x8xf32>
    %89 = arith.truncf %88 : vector<8x8xf32> to vector<8x8xbf16>
    %90 = arith.truncf %73 : vector<8x8xf32> to vector<8x8xbf16>
    %cst_36 = arith.constant dense<0.000000e+00> : vector<8x8xf32>
    %91 = tpu.matmul %89, %90, %cst_36 {dimension_numbers = #tpu.dot_dimension_numbers<[1], [0], [0], [1], [0, 0, 1, 1], [], []>} : vector<8x8xbf16>, vector<8x8xbf16>, vector<8x8xf32> -> vector<8x8xf32>
    %92 = vector.extract_strided_slice %26 {offsets = [0, 24], sizes = [8, 8], strides = [1, 1]} : vector<8x32xf32> to vector<8x8xf32>
    %93 = vector.extract_strided_slice %27 {offsets = [0, 24], sizes = [8, 8], strides = [1, 1]} : vector<8x32xf32> to vector<8x8xf32>
    %94 = vector.extract_strided_slice %28 {offsets = [0, 24], sizes = [8, 8], strides = [1, 1]} : vector<8x32xf32> to vector<8x8xf32>
    %95 = arith.truncf %92 : vector<8x8xf32> to vector<8x8xbf16>
    %96 = arith.truncf %93 : vector<8x8xf32> to vector<8x8xbf16>
    %cst_37 = arith.constant dense<0.000000e+00> : vector<8x8xf32>
    %97 = tpu.matmul %95, %96, %cst_37 {dimension_numbers = #tpu.dot_dimension_numbers<[1], [1], [0], [0], [0, 0, 1, 0], [], []>} : vector<8x8xbf16>, vector<8x8xbf16>, vector<8x8xf32> -> vector<8x8xf32>
    %cst_38 = arith.constant 0.353553385 : f32
    %98 = vector.broadcast %cst_38 : f32 to vector<8x8xf32>
    %99 = arith.mulf %97, %98 : vector<8x8xf32>
    %cst_39 = arith.constant dense<0xFF800000> : vector<8xf32>
    %100 = vector.multi_reduction <maximumf>, %99, %cst_39 [1] : vector<8x8xf32> to vector<8xf32>
    %101 = vector.shape_cast %100 : vector<8xf32> to vector<8x1xf32>
    %102 = vector.broadcast %101 : vector<8x1xf32> to vector<8x8xf32>
    %103 = arith.subf %99, %102 : vector<8x8xf32>
    %104 = math.exp %103 : vector<8x8xf32>
    %cst_40 = arith.constant dense<0.000000e+00> : vector<8xf32>
    %105 = vector.multi_reduction <add>, %104, %cst_40 [1] : vector<8x8xf32> to vector<8xf32>
    %106 = vector.shape_cast %105 : vector<8xf32> to vector<8x1xf32>
    %107 = tpu.reciprocal %106 {approx = true} : vector<8x1xf32> -> vector<8x1xf32>
    %108 = vector.broadcast %107 : vector<8x1xf32> to vector<8x8xf32>
    %109 = arith.mulf %104, %108 : vector<8x8xf32>
    %110 = arith.truncf %109 : vector<8x8xf32> to vector<8x8xbf16>
    %111 = arith.truncf %94 : vector<8x8xf32> to vector<8x8xbf16>
    %cst_41 = arith.constant dense<0.000000e+00> : vector<8x8xf32>
    %112 = tpu.matmul %110, %111, %cst_41 {dimension_numbers = #tpu.dot_dimension_numbers<[1], [0], [0], [1], [0, 0, 1, 1], [], []>} : vector<8x8xbf16>, vector<8x8xbf16>, vector<8x8xf32> -> vector<8x8xf32>
    %113 = tpu.concatenate %49, %70, %91, %112 in 1 : vector<8x8xf32>, vector<8x8xf32>, vector<8x8xf32>, vector<8x8xf32> -> vector<8x32xf32>
    %114 = vector.extract_strided_slice %11 {offsets = [8, 0], sizes = [8, 32], strides = [1, 1]} : vector<16x32xf32> to vector<8x32xf32>
    %115 = vector.extract_strided_slice %18 {offsets = [8, 0], sizes = [8, 32], strides = [1, 1]} : vector<16x32xf32> to vector<8x32xf32>
    %116 = vector.extract_strided_slice %25 {offsets = [8, 0], sizes = [8, 32], strides = [1, 1]} : vector<16x32xf32> to vector<8x32xf32>
    %117 = vector.extract_strided_slice %114 {offsets = [0, 0], sizes = [8, 8], strides = [1, 1]} : vector<8x32xf32> to vector<8x8xf32>
    %118 = vector.extract_strided_slice %115 {offsets = [0, 0], sizes = [8, 8], strides = [1, 1]} : vector<8x32xf32> to vector<8x8xf32>
    %119 = vector.extract_strided_slice %116 {offsets = [0, 0], sizes = [8, 8], strides = [1, 1]} : vector<8x32xf32> to vector<8x8xf32>
    %120 = arith.truncf %117 : vector<8x8xf32> to vector<8x8xbf16>
    %121 = arith.truncf %118 : vector<8x8xf32> to vector<8x8xbf16>
    %cst_42 = arith.constant dense<0.000000e+00> : vector<8x8xf32>
    %122 = tpu.matmul %120, %121, %cst_42 {dimension_numbers = #tpu.dot_dimension_numbers<[1], [1], [0], [0], [0, 0, 1, 0], [], []>} : vector<8x8xbf16>, vector<8x8xbf16>, vector<8x8xf32> -> vector<8x8xf32>
    %cst_43 = arith.constant 0.353553385 : f32
    %123 = vector.broadcast %cst_43 : f32 to vector<8x8xf32>
    %124 = arith.mulf %122, %123 : vector<8x8xf32>
    %cst_44 = arith.constant dense<0xFF800000> : vector<8xf32>
    %125 = vector.multi_reduction <maximumf>, %124, %cst_44 [1] : vector<8x8xf32> to vector<8xf32>
    %126 = vector.shape_cast %125 : vector<8xf32> to vector<8x1xf32>
    %127 = vector.broadcast %126 : vector<8x1xf32> to vector<8x8xf32>
    %128 = arith.subf %124, %127 : vector<8x8xf32>
    %129 = math.exp %128 : vector<8x8xf32>
    %cst_45 = arith.constant dense<0.000000e+00> : vector<8xf32>
    %130 = vector.multi_reduction <add>, %129, %cst_45 [1] : vector<8x8xf32> to vector<8xf32>
    %131 = vector.shape_cast %130 : vector<8xf32> to vector<8x1xf32>
    %132 = tpu.reciprocal %131 {approx = true} : vector<8x1xf32> -> vector<8x1xf32>
    %133 = vector.broadcast %132 : vector<8x1xf32> to vector<8x8xf32>
    %134 = arith.mulf %129, %133 : vector<8x8xf32>
    %135 = arith.truncf %134 : vector<8x8xf32> to vector<8x8xbf16>
    %136 = arith.truncf %119 : vector<8x8xf32> to vector<8x8xbf16>
    %cst_46 = arith.constant dense<0.000000e+00> : vector<8x8xf32>
    %137 = tpu.matmul %135, %136, %cst_46 {dimension_numbers = #tpu.dot_dimension_numbers<[1], [0], [0], [1], [0, 0, 1, 1], [], []>} : vector<8x8xbf16>, vector<8x8xbf16>, vector<8x8xf32> -> vector<8x8xf32>
    %138 = vector.extract_strided_slice %114 {offsets = [0, 8], sizes = [8, 8], strides = [1, 1]} : vector<8x32xf32> to vector<8x8xf32>
    %139 = vector.extract_strided_slice %115 {offsets = [0, 8], sizes = [8, 8], strides = [1, 1]} : vector<8x32xf32> to vector<8x8xf32>
    %140 = vector.extract_strided_slice %116 {offsets = [0, 8], sizes = [8, 8], strides = [1, 1]} : vector<8x32xf32> to vector<8x8xf32>
    %141 = arith.truncf %138 : vector<8x8xf32> to vector<8x8xbf16>
    %142 = arith.truncf %139 : vector<8x8xf32> to vector<8x8xbf16>
    %cst_47 = arith.constant dense<0.000000e+00> : vector<8x8xf32>
    %143 = tpu.matmul %141, %142, %cst_47 {dimension_numbers = #tpu.dot_dimension_numbers<[1], [1], [0], [0], [0, 0, 1, 0], [], []>} : vector<8x8xbf16>, vector<8x8xbf16>, vector<8x8xf32> -> vector<8x8xf32>
    %cst_48 = arith.constant 0.353553385 : f32
    %144 = vector.broadcast %cst_48 : f32 to vector<8x8xf32>
    %145 = arith.mulf %143, %144 : vector<8x8xf32>
    %cst_49 = arith.constant dense<0xFF800000> : vector<8xf32>
    %146 = vector.multi_reduction <maximumf>, %145, %cst_49 [1] : vector<8x8xf32> to vector<8xf32>
    %147 = vector.shape_cast %146 : vector<8xf32> to vector<8x1xf32>
    %148 = vector.broadcast %147 : vector<8x1xf32> to vector<8x8xf32>
    %149 = arith.subf %145, %148 : vector<8x8xf32>
    %150 = math.exp %149 : vector<8x8xf32>
    %cst_50 = arith.constant dense<0.000000e+00> : vector<8xf32>
    %151 = vector.multi_reduction <add>, %150, %cst_50 [1] : vector<8x8xf32> to vector<8xf32>
    %152 = vector.shape_cast %151 : vector<8xf32> to vector<8x1xf32>
    %153 = tpu.reciprocal %152 {approx = true} : vector<8x1xf32> -> vector<8x1xf32>
    %154 = vector.broadcast %153 : vector<8x1xf32> to vector<8x8xf32>
    %155 = arith.mulf %150, %154 : vector<8x8xf32>
    %156 = arith.truncf %155 : vector<8x8xf32> to vector<8x8xbf16>
    %157 = arith.truncf %140 : vector<8x8xf32> to vector<8x8xbf16>
    %cst_51 = arith.constant dense<0.000000e+00> : vector<8x8xf32>
    %158 = tpu.matmul %156, %157, %cst_51 {dimension_numbers = #tpu.dot_dimension_numbers<[1], [0], [0], [1], [0, 0, 1, 1], [], []>} : vector<8x8xbf16>, vector<8x8xbf16>, vector<8x8xf32> -> vector<8x8xf32>
    %159 = vector.extract_strided_slice %114 {offsets = [0, 16], sizes = [8, 8], strides = [1, 1]} : vector<8x32xf32> to vector<8x8xf32>
    %160 = vector.extract_strided_slice %115 {offsets = [0, 16], sizes = [8, 8], strides = [1, 1]} : vector<8x32xf32> to vector<8x8xf32>
    %161 = vector.extract_strided_slice %116 {offsets = [0, 16], sizes = [8, 8], strides = [1, 1]} : vector<8x32xf32> to vector<8x8xf32>
    %162 = arith.truncf %159 : vector<8x8xf32> to vector<8x8xbf16>
    %163 = arith.truncf %160 : vector<8x8xf32> to vector<8x8xbf16>
    %cst_52 = arith.constant dense<0.000000e+00> : vector<8x8xf32>
    %164 = tpu.matmul %162, %163, %cst_52 {dimension_numbers = #tpu.dot_dimension_numbers<[1], [1], [0], [0], [0, 0, 1, 0], [], []>} : vector<8x8xbf16>, vector<8x8xbf16>, vector<8x8xf32> -> vector<8x8xf32>
    %cst_53 = arith.constant 0.353553385 : f32
    %165 = vector.broadcast %cst_53 : f32 to vector<8x8xf32>
    %166 = arith.mulf %164, %165 : vector<8x8xf32>
    %cst_54 = arith.constant dense<0xFF800000> : vector<8xf32>
    %167 = vector.multi_reduction <maximumf>, %166, %cst_54 [1] : vector<8x8xf32> to vector<8xf32>
    %168 = vector.shape_cast %167 : vector<8xf32> to vector<8x1xf32>
    %169 = vector.broadcast %168 : vector<8x1xf32> to vector<8x8xf32>
    %170 = arith.subf %166, %169 : vector<8x8xf32>
    %171 = math.exp %170 : vector<8x8xf32>
    %cst_55 = arith.constant dense<0.000000e+00> : vector<8xf32>
    %172 = vector.multi_reduction <add>, %171, %cst_55 [1] : vector<8x8xf32> to vector<8xf32>
    %173 = vector.shape_cast %172 : vector<8xf32> to vector<8x1xf32>
    %174 = tpu.reciprocal %173 {approx = true} : vector<8x1xf32> -> vector<8x1xf32>
    %175 = vector.broadcast %174 : vector<8x1xf32> to vector<8x8xf32>
    %176 = arith.mulf %171, %175 : vector<8x8xf32>
    %177 = arith.truncf %176 : vector<8x8xf32> to vector<8x8xbf16>
    %178 = arith.truncf %161 : vector<8x8xf32> to vector<8x8xbf16>
    %cst_56 = arith.constant dense<0.000000e+00> : vector<8x8xf32>
    %179 = tpu.matmul %177, %178, %cst_56 {dimension_numbers = #tpu.dot_dimension_numbers<[1], [0], [0], [1], [0, 0, 1, 1], [], []>} : vector<8x8xbf16>, vector<8x8xbf16>, vector<8x8xf32> -> vector<8x8xf32>
    %180 = vector.extract_strided_slice %114 {offsets = [0, 24], sizes = [8, 8], strides = [1, 1]} : vector<8x32xf32> to vector<8x8xf32>
    %181 = vector.extract_strided_slice %115 {offsets = [0, 24], sizes = [8, 8], strides = [1, 1]} : vector<8x32xf32> to vector<8x8xf32>
    %182 = vector.extract_strided_slice %116 {offsets = [0, 24], sizes = [8, 8], strides = [1, 1]} : vector<8x32xf32> to vector<8x8xf32>
    %183 = arith.truncf %180 : vector<8x8xf32> to vector<8x8xbf16>
    %184 = arith.truncf %181 : vector<8x8xf32> to vector<8x8xbf16>
    %cst_57 = arith.constant dense<0.000000e+00> : vector<8x8xf32>
    %185 = tpu.matmul %183, %184, %cst_57 {dimension_numbers = #tpu.dot_dimension_numbers<[1], [1], [0], [0], [0, 0, 1, 0], [], []>} : vector<8x8xbf16>, vector<8x8xbf16>, vector<8x8xf32> -> vector<8x8xf32>
    %cst_58 = arith.constant 0.353553385 : f32
    %186 = vector.broadcast %cst_58 : f32 to vector<8x8xf32>
    %187 = arith.mulf %185, %186 : vector<8x8xf32>
    %cst_59 = arith.constant dense<0xFF800000> : vector<8xf32>
    %188 = vector.multi_reduction <maximumf>, %187, %cst_59 [1] : vector<8x8xf32> to vector<8xf32>
    %189 = vector.shape_cast %188 : vector<8xf32> to vector<8x1xf32>
    %190 = vector.broadcast %189 : vector<8x1xf32> to vector<8x8xf32>
    %191 = arith.subf %187, %190 : vector<8x8xf32>
    %192 = math.exp %191 : vector<8x8xf32>
    %cst_60 = arith.constant dense<0.000000e+00> : vector<8xf32>
    %193 = vector.multi_reduction <add>, %192, %cst_60 [1] : vector<8x8xf32> to vector<8xf32>
    %194 = vector.shape_cast %193 : vector<8xf32> to vector<8x1xf32>
    %195 = tpu.reciprocal %194 {approx = true} : vector<8x1xf32> -> vector<8x1xf32>
    %196 = vector.broadcast %195 : vector<8x1xf32> to vector<8x8xf32>
    %197 = arith.mulf %192, %196 : vector<8x8xf32>
    %198 = arith.truncf %197 : vector<8x8xf32> to vector<8x8xbf16>
    %199 = arith.truncf %182 : vector<8x8xf32> to vector<8x8xbf16>
    %cst_61 = arith.constant dense<0.000000e+00> : vector<8x8xf32>
    %200 = tpu.matmul %198, %199, %cst_61 {dimension_numbers = #tpu.dot_dimension_numbers<[1], [0], [0], [1], [0, 0, 1, 1], [], []>} : vector<8x8xbf16>, vector<8x8xbf16>, vector<8x8xf32> -> vector<8x8xf32>
    %201 = tpu.concatenate %137, %158, %179, %200 in 1 : vector<8x8xf32>, vector<8x8xf32>, vector<8x8xf32>, vector<8x8xf32> -> vector<8x32xf32>
    %202 = tpu.concatenate %113, %201 in 0 : vector<8x32xf32>, vector<8x32xf32> -> vector<16x32xf32>
    %c0_62 = arith.constant 0 : index
    %c0_63 = arith.constant 0 : index
    %c0_64 = arith.constant 0 : index
    %203 = vector.load %arg11[%c0_62, %c0_63, %c0_64] : memref<1x32x32xbf16, #tpu.memory_space<vmem>>, vector<1x32x32xbf16>
    %204 = vector.shape_cast %203 : vector<1x32x32xbf16> to vector<32x32xbf16>
    %205 = arith.truncf %202 : vector<16x32xf32> to vector<16x32xbf16>
    %cst_65 = arith.constant dense<0.000000e+00> : vector<16x32xf32>
    %206 = tpu.matmul %205, %204, %cst_65 {dimension_numbers = #tpu.dot_dimension_numbers<[1], [0], [0], [1], [0, 0, 1, 1], [], []>} : vector<16x32xbf16>, vector<32x32xbf16>, vector<16x32xf32> -> vector<16x32xf32>
    %c0_66 = arith.constant 0 : index
    %c0_67 = arith.constant 0 : index
    %c0_68 = arith.constant 0 : index
    %207 = vector.load %arg12[%c0_66, %c0_67, %c0_68] : memref<1x1x32xf32, #tpu.memory_space<vmem>>, vector<1x1x32xf32>
    %208 = vector.shape_cast %207 : vector<1x1x32xf32> to vector<1x32xf32>
    %209 = vector.broadcast %208 : vector<1x32xf32> to vector<16x32xf32>
    %210 = arith.addf %206, %209 : vector<16x32xf32>
    %211 = arith.addf %3, %210 : vector<16x32xf32>
    %c0_69 = arith.constant 0 : index
    %c0_70 = arith.constant 0 : index
    %c0_71 = arith.constant 0 : index
    %212 = vector.load %arg13[%c0_69, %c0_70, %c0_71] : memref<1x1x32xf32, #tpu.memory_space<vmem>>, vector<1x1x32xf32>
    %213 = vector.shape_cast %212 : vector<1x1x32xf32> to vector<1x32xf32>
    %c0_72 = arith.constant 0 : index
    %c0_73 = arith.constant 0 : index
    %c0_74 = arith.constant 0 : index
    %214 = vector.load %arg14[%c0_72, %c0_73, %c0_74] : memref<1x1x32xf32, #tpu.memory_space<vmem>>, vector<1x1x32xf32>
    %215 = vector.shape_cast %214 : vector<1x1x32xf32> to vector<1x32xf32>
    %cst_75 = arith.constant dense<0.000000e+00> : vector<16xf32>
    %216 = vector.multi_reduction <add>, %211, %cst_75 [1] : vector<16x32xf32> to vector<16xf32>
    %217 = vector.shape_cast %216 : vector<16xf32> to vector<16x1xf32>
    %cst_76 = arith.constant 3.200000e+01 : f32
    %218 = vector.broadcast %cst_76 : f32 to vector<16x1xf32>
    %219 = arith.divf %217, %218 : vector<16x1xf32>
    %220 = vector.broadcast %219 : vector<16x1xf32> to vector<16x32xf32>
    %221 = arith.subf %211, %220 : vector<16x32xf32>
    %222 = arith.mulf %221, %221 : vector<16x32xf32>
    %cst_77 = arith.constant dense<0.000000e+00> : vector<16xf32>
    %223 = vector.multi_reduction <add>, %222, %cst_77 [1] : vector<16x32xf32> to vector<16xf32>
    %224 = vector.shape_cast %223 : vector<16xf32> to vector<16x1xf32>
    %cst_78 = arith.constant 3.200000e+01 : f32
    %225 = vector.broadcast %cst_78 : f32 to vector<16x1xf32>
    %226 = arith.divf %224, %225 : vector<16x1xf32>
    %227 = vector.broadcast %219 : vector<16x1xf32> to vector<16x32xf32>
    %228 = arith.subf %211, %227 : vector<16x32xf32>
    %cst_79 = arith.constant 9.99999974E-6 : f32
    %229 = vector.broadcast %cst_79 : f32 to vector<16x1xf32>
    %230 = arith.addf %226, %229 : vector<16x1xf32>
    %231 = math.rsqrt %230 : vector<16x1xf32>
    %232 = vector.broadcast %231 : vector<16x1xf32> to vector<16x32xf32>
    %233 = arith.mulf %228, %232 : vector<16x32xf32>
    %234 = vector.broadcast %213 : vector<1x32xf32> to vector<16x32xf32>
    %235 = arith.mulf %233, %234 : vector<16x32xf32>
    %236 = vector.broadcast %215 : vector<1x32xf32> to vector<16x32xf32>
    %237 = arith.addf %235, %236 : vector<16x32xf32>
    %c0_80 = arith.constant 0 : index
    %c0_81 = arith.constant 0 : index
    %c0_82 = arith.constant 0 : index
    %238 = vector.load %arg15[%c0_80, %c0_81, %c0_82] : memref<1x32x2048xbf16, #tpu.memory_space<vmem>>, vector<1x32x2048xbf16>
    %239 = vector.shape_cast %238 : vector<1x32x2048xbf16> to vector<32x2048xbf16>
    %240 = arith.truncf %237 : vector<16x32xf32> to vector<16x32xbf16>
    %cst_83 = arith.constant dense<0.000000e+00> : vector<16x2048xf32>
    %241 = tpu.matmul %240, %239, %cst_83 {dimension_numbers = #tpu.dot_dimension_numbers<[1], [0], [0], [1], [0, 0, 1, 1], [], []>} : vector<16x32xbf16>, vector<32x2048xbf16>, vector<16x2048xf32> -> vector<16x2048xf32>
    %c0_84 = arith.constant 0 : index
    %c0_85 = arith.constant 0 : index
    %c0_86 = arith.constant 0 : index
    %242 = vector.load %arg16[%c0_84, %c0_85, %c0_86] : memref<1x1x2048xf32, #tpu.memory_space<vmem>>, vector<1x1x2048xf32>
    %243 = vector.shape_cast %242 : vector<1x1x2048xf32> to vector<1x2048xf32>
    %244 = vector.broadcast %243 : vector<1x2048xf32> to vector<16x2048xf32>
    %245 = arith.addf %241, %244 : vector<16x2048xf32>
    %cst_87 = arith.constant 0.000000e+00 : f32
    %246 = vector.broadcast %cst_87 : f32 to vector<16x2048xf32>
    %247 = arith.maximumf %245, %246 : vector<16x2048xf32>
    %248 = arith.truncf %247 : vector<16x2048xf32> to vector<16x2048xbf16>
    %c0_88 = arith.constant 0 : index
    %c0_89 = arith.constant 0 : index
    %c0_90 = arith.constant 0 : index
    %249 = vector.load %arg17[%c0_88, %c0_89, %c0_90] : memref<1x2048x32xbf16, #tpu.memory_space<vmem>>, vector<1x2048x32xbf16>
    %250 = vector.shape_cast %249 : vector<1x2048x32xbf16> to vector<2048x32xbf16>
    %cst_91 = arith.constant dense<0.000000e+00> : vector<16x32xf32>
    %251 = tpu.matmul %248, %250, %cst_91 {dimension_numbers = #tpu.dot_dimension_numbers<[1], [0], [0], [1], [0, 0, 1, 1], [], []>} : vector<16x2048xbf16>, vector<2048x32xbf16>, vector<16x32xf32> -> vector<16x32xf32>
    %c0_92 = arith.constant 0 : index
    %c0_93 = arith.constant 0 : index
    %c0_94 = arith.constant 0 : index
    %252 = vector.load %arg18[%c0_92, %c0_93, %c0_94] : memref<1x1x32xf32, #tpu.memory_space<vmem>>, vector<1x1x32xf32>
    %253 = vector.shape_cast %252 : vector<1x1x32xf32> to vector<1x32xf32>
    %254 = vector.broadcast %253 : vector<1x32xf32> to vector<16x32xf32>
    %255 = arith.addf %251, %254 : vector<16x32xf32>
    %256 = arith.addf %237, %255 : vector<16x32xf32>
    %c0_95 = arith.constant 0 : index
    %c0_96 = arith.constant 0 : index
    %c0_97 = arith.constant 0 : index
    %257 = vector.load %arg19[%c0_95, %c0_96, %c0_97] : memref<1x1x32xf32, #tpu.memory_space<vmem>>, vector<1x1x32xf32>
    %258 = vector.shape_cast %257 : vector<1x1x32xf32> to vector<1x32xf32>
    %c0_98 = arith.constant 0 : index
    %c0_99 = arith.constant 0 : index
    %c0_100 = arith.constant 0 : index
    %259 = vector.load %arg20[%c0_98, %c0_99, %c0_100] : memref<1x1x32xf32, #tpu.memory_space<vmem>>, vector<1x1x32xf32>
    %260 = vector.shape_cast %259 : vector<1x1x32xf32> to vector<1x32xf32>
    %cst_101 = arith.constant dense<0.000000e+00> : vector<16xf32>
    %261 = vector.multi_reduction <add>, %256, %cst_101 [1] : vector<16x32xf32> to vector<16xf32>
    %262 = vector.shape_cast %261 : vector<16xf32> to vector<16x1xf32>
    %cst_102 = arith.constant 3.200000e+01 : f32
    %263 = vector.broadcast %cst_102 : f32 to vector<16x1xf32>
    %264 = arith.divf %262, %263 : vector<16x1xf32>
    %265 = vector.broadcast %264 : vector<16x1xf32> to vector<16x32xf32>
    %266 = arith.subf %256, %265 : vector<16x32xf32>
    %267 = arith.mulf %266, %266 : vector<16x32xf32>
    %cst_103 = arith.constant dense<0.000000e+00> : vector<16xf32>
    %268 = vector.multi_reduction <add>, %267, %cst_103 [1] : vector<16x32xf32> to vector<16xf32>
    %269 = vector.shape_cast %268 : vector<16xf32> to vector<16x1xf32>
    %cst_104 = arith.constant 3.200000e+01 : f32
    %270 = vector.broadcast %cst_104 : f32 to vector<16x1xf32>
    %271 = arith.divf %269, %270 : vector<16x1xf32>
    %272 = vector.broadcast %264 : vector<16x1xf32> to vector<16x32xf32>
    %273 = arith.subf %256, %272 : vector<16x32xf32>
    %cst_105 = arith.constant 9.99999974E-6 : f32
    %274 = vector.broadcast %cst_105 : f32 to vector<16x1xf32>
    %275 = arith.addf %271, %274 : vector<16x1xf32>
    %276 = math.rsqrt %275 : vector<16x1xf32>
    %277 = vector.broadcast %276 : vector<16x1xf32> to vector<16x32xf32>
    %278 = arith.mulf %273, %277 : vector<16x32xf32>
    %279 = vector.broadcast %258 : vector<1x32xf32> to vector<16x32xf32>
    %280 = arith.mulf %278, %279 : vector<16x32xf32>
    %281 = vector.broadcast %260 : vector<1x32xf32> to vector<16x32xf32>
    %282 = arith.addf %280, %281 : vector<16x32xf32>
    %c0_106 = arith.constant 0 : index
    %c0_107 = arith.constant 0 : index
    %283 = vector.load %arg24[%c0_106, %c0_107] : memref<16x32xf32, #tpu.memory_space<vmem>>, vector<16x32xf32>
    tpu.vector_store %arg24[%c0_106, %c0_107], %282 {strides = array<i32>} : memref<16x32xf32, #tpu.memory_space<vmem>>, vector<16x32xf32>,
    %c3_i32 = arith.constant 3 : i32
    %284 = arith.cmpi eq, %arg1, %c3_i32 : i32
    %285 = arith.extui %284 : i1 to i32
    %c0_i32_108 = arith.constant 0 : i32
    %286 = arith.cmpi ne, %285, %c0_i32_108 : i32
    scf.if %286 {
      %c0_109 = arith.constant 0 : index
      %c0_110 = arith.constant 0 : index
      %287 = vector.load %arg21[%c0_109, %c0_110] : memref<32x16xbf16, #tpu.memory_space<vmem>>, vector<32x16xbf16>
      %288 = arith.truncf %282 : vector<16x32xf32> to vector<16x32xbf16>
      %cst_111 = arith.constant dense<0.000000e+00> : vector<16x16xf32>
      %289 = tpu.matmul %288, %287, %cst_111 {dimension_numbers = #tpu.dot_dimension_numbers<[1], [0], [0], [1], [0, 0, 1, 1], [], []>} : vector<16x32xbf16>, vector<32x16xbf16>, vector<16x16xf32> -> vector<16x16xf32>
      %c0_112 = arith.constant 0 : index
      %c0_113 = arith.constant 0 : index
      %290 = vector.load %arg22[%c0_112, %c0_113] : memref<1x16xf32, #tpu.memory_space<vmem>>, vector<1x16xf32>
      %291 = vector.broadcast %290 : vector<1x16xf32> to vector<16x16xf32>
      %292 = arith.addf %289, %291 : vector<16x16xf32>
      %c0_114 = arith.constant 0 : index
      %c0_115 = arith.constant 0 : index
      %293 = vector.load %arg23[%c0_114, %c0_115] : memref<16x16xf32, #tpu.memory_space<vmem>>, vector<16x16xf32>
      tpu.vector_store %arg23[%c0_114, %c0_115], %292 {strides = array<i32>} : memref<16x16xf32, #tpu.memory_space<vmem>>, vector<16x16xf32>,
    } else {
    }
    return
  }
  func.func @transform_0(%arg0: i32, %arg1: i32) -> (i32, i32) {
    %c0_i32 = arith.constant 0 : i32
    %c0_i32_0 = arith.constant 0 : i32
    return %arg0, %c0_i32 : i32, i32
  }
  func.func @transform_1(%arg0: i32, %arg1: i32) -> (i32, i32) {
    %c0_i32 = arith.constant 0 : i32
    %c0_i32_0 = arith.constant 0 : i32
    %c0_i32_1 = arith.constant 0 : i32
    return %c0_i32, %c0_i32_0 : i32, i32
  }
  func.func @transform_2(%arg0: i32, %arg1: i32) -> (i32, i32) {
    %c0_i32 = arith.constant 0 : i32
    %c0_i32_0 = arith.constant 0 : i32
    %c0_i32_1 = arith.constant 0 : i32
    return %c0_i32, %c0_i32_0 : i32, i32
  }
  func.func @transform_3(%arg0: i32, %arg1: i32) -> (i32, i32, i32) {
    %c0_i32 = arith.constant 0 : i32
    %c0_i32_0 = arith.constant 0 : i32
    %c0_i32_1 = arith.constant 0 : i32
    return %arg1, %c0_i32, %c0_i32_0 : i32, i32, i32
  }
  func.func @transform_4(%arg0: i32, %arg1: i32) -> (i32, i32, i32) {
    %c0_i32 = arith.constant 0 : i32
    %c0_i32_0 = arith.constant 0 : i32
    %c0_i32_1 = arith.constant 0 : i32
    return %arg1, %c0_i32, %c0_i32_0 : i32, i32, i32
  }
  func.func @transform_5(%arg0: i32, %arg1: i32) -> (i32, i32, i32) {
    %c0_i32 = arith.constant 0 : i32
    %c0_i32_0 = arith.constant 0 : i32
    %c0_i32_1 = arith.constant 0 : i32
    return %arg1, %c0_i32, %c0_i32_0 : i32, i32, i32
  }
  func.func @transform_6(%arg0: i32, %arg1: i32) -> (i32, i32, i32) {
    %c0_i32 = arith.constant 0 : i32
    %c0_i32_0 = arith.constant 0 : i32
    %c0_i32_1 = arith.constant 0 : i32
    return %arg1, %c0_i32, %c0_i32_0 : i32, i32, i32
  }
  func.func @transform_7(%arg0: i32, %arg1: i32) -> (i32, i32, i32) {
    %c0_i32 = arith.constant 0 : i32
    %c0_i32_0 = arith.constant 0 : i32
    %c0_i32_1 = arith.constant 0 : i32
    return %arg1, %c0_i32, %c0_i32_0 : i32, i32, i32
  }
  func.func @transform_8(%arg0: i32, %arg1: i32) -> (i32, i32, i32) {
    %c0_i32 = arith.constant 0 : i32
    %c0_i32_0 = arith.constant 0 : i32
    %c0_i32_1 = arith.constant 0 : i32
    return %arg1, %c0_i32, %c0_i32_0 : i32, i32, i32
  }
  func.func @transform_9(%arg0: i32, %arg1: i32) -> (i32, i32, i32) {
    %c0_i32 = arith.constant 0 : i32
    %c0_i32_0 = arith.constant 0 : i32
    %c0_i32_1 = arith.constant 0 : i32
    return %arg1, %c0_i32, %c0_i32_0 : i32, i32, i32
  }
  func.func @transform_10(%arg0: i32, %arg1: i32) -> (i32, i32, i32) {
    %c0_i32 = arith.constant 0 : i32
    %c0_i32_0 = arith.constant 0 : i32
    %c0_i32_1 = arith.constant 0 : i32
    return %arg1, %c0_i32, %c0_i32_0 : i32, i32, i32
  }
  func.func @transform_11(%arg0: i32, %arg1: i32) -> (i32, i32, i32) {
    %c0_i32 = arith.constant 0 : i32
    %c0_i32_0 = arith.constant 0 : i32
    %c0_i32_1 = arith.constant 0 : i32
    return %arg1, %c0_i32, %c0_i32_0 : i32, i32, i32
  }
  func.func @transform_12(%arg0: i32, %arg1: i32) -> (i32, i32, i32) {
    %c0_i32 = arith.constant 0 : i32
    %c0_i32_0 = arith.constant 0 : i32
    %c0_i32_1 = arith.constant 0 : i32
    return %arg1, %c0_i32, %c0_i32_0 : i32, i32, i32
  }
  func.func @transform_13(%arg0: i32, %arg1: i32) -> (i32, i32, i32) {
    %c0_i32 = arith.constant 0 : i32
    %c0_i32_0 = arith.constant 0 : i32
    %c0_i32_1 = arith.constant 0 : i32
    return %arg1, %c0_i32, %c0_i32_0 : i32, i32, i32
  }
  func.func @transform_14(%arg0: i32, %arg1: i32) -> (i32, i32, i32) {
    %c0_i32 = arith.constant 0 : i32
    %c0_i32_0 = arith.constant 0 : i32
    %c0_i32_1 = arith.constant 0 : i32
    return %arg1, %c0_i32, %c0_i32_0 : i32, i32, i32
  }
  func.func @transform_15(%arg0: i32, %arg1: i32) -> (i32, i32, i32) {
    %c0_i32 = arith.constant 0 : i32
    %c0_i32_0 = arith.constant 0 : i32
    %c0_i32_1 = arith.constant 0 : i32
    return %arg1, %c0_i32, %c0_i32_0 : i32, i32, i32
  }
  func.func @transform_16(%arg0: i32, %arg1: i32) -> (i32, i32, i32) {
    %c0_i32 = arith.constant 0 : i32
    %c0_i32_0 = arith.constant 0 : i32
    %c0_i32_1 = arith.constant 0 : i32
    return %arg1, %c0_i32, %c0_i32_0 : i32, i32, i32
  }
  func.func @transform_17(%arg0: i32, %arg1: i32) -> (i32, i32, i32) {
    %c0_i32 = arith.constant 0 : i32
    %c0_i32_0 = arith.constant 0 : i32
    %c0_i32_1 = arith.constant 0 : i32
    return %arg1, %c0_i32, %c0_i32_0 : i32, i32, i32
  }
  func.func @transform_18(%arg0: i32, %arg1: i32) -> (i32, i32, i32) {
    %c0_i32 = arith.constant 0 : i32
    %c0_i32_0 = arith.constant 0 : i32
    %c0_i32_1 = arith.constant 0 : i32
    return %arg1, %c0_i32, %c0_i32_0 : i32, i32, i32
  }
  func.func @transform_19(%arg0: i32, %arg1: i32) -> (i32, i32) {
    %c0_i32 = arith.constant 0 : i32
    %c0_i32_0 = arith.constant 0 : i32
    %c0_i32_1 = arith.constant 0 : i32
    return %c0_i32, %c0_i32_0 : i32, i32
  }
  func.func @transform_20(%arg0: i32, %arg1: i32) -> (i32, i32) {
    %c0_i32 = arith.constant 0 : i32
    %c0_i32_0 = arith.constant 0 : i32
    %c0_i32_1 = arith.constant 0 : i32
    return %c0_i32, %c0_i32_0 : i32, i32
  }
  func.func @transform_21(%arg0: i32, %arg1: i32) -> (i32, i32) {
    %c0_i32 = arith.constant 0 : i32
    %c0_i32_0 = arith.constant 0 : i32
    return %arg0, %c0_i32 : i32, i32
  }
}

</mosaic_0001>

<bundles_post_ra>
// kernel: tpu_custom_call.1
= control target key start
LH: loop header
LB: loop body
LE: loop exit
PB: predicated region body
PF: predicated region fallthrough
CT: control target
= control target key end

     0   :  { %s6332_s0 = inlined_call_operand.vmem [shape: f32[16,16], index: 0, kind: input, shape index: {}]   ;;  %s6333_s1 = inlined_call_operand.vmem [shape: bf16[16,32], index: 1, kind: input, shape index: {}]   ;;  %s6334_s2 = inlined_call_operand.vmem [shape: f32[1,32], index: 2, kind: input, shape index: {}]   ;;  %s6335_s3 = inlined_call_operand.vmem [shape: bf16[4,32,32], index: 3, kind: input, shape index: {}]   ;;  %s6336_s4 = inlined_call_operand.vmem [shape: f32[4,1,32], index: 4, kind: input, shape index: {}]   ;;  %s6337_s5 = inlined_call_operand.vmem [shape: bf16[4,32,32], index: 5, kind: input, shape index: {}]   ;;  %s6338_s6 = inlined_call_operand.vmem [shape: f32[4,1,32], index: 6, kind: input, shape index: {}]   ;;  %s6339_s7 = inlined_call_operand.vmem [shape: bf16[4,32,32], index: 7, kind: input, shape index: {}]   ;;  %s6340_s8 = inlined_call_operand.vmem [shape: f32[4,1,32], index: 8, kind: input, shape index: {}]   ;;  %s6341_s9 = inlined_call_operand.vmem [shape: bf16[4,32,32], index: 9, kind: input, shape index: {}]   ;;  %s6342_s10 = inlined_call_operand.vmem [shape: f32[4,1,32], index: 10, kind: input, shape index: {}]   ;;  %s6343_s11 = inlined_call_operand.vmem [shape: f32[4,1,32], index: 11, kind: input, shape index: {}]   ;;  %s6344_s12 = inlined_call_operand.vmem [shape: f32[4,1,32], index: 12, kind: input, shape index: {}]   ;;  %s6345_s13 = inlined_call_operand.vmem [shape: bf16[4,32,2048], index: 13, kind: input, shape index: {}]   ;;  %s6346_s14 = inlined_call_operand.vmem [shape: f32[4,1,2048], index: 14, kind: input, shape index: {}]   ;;  %s6347_s15 = inlined_call_operand.vmem [shape: bf16[4,2048,32], index: 15, kind: input, shape index: {}]   ;;  %s6348_s16 = inlined_call_operand.vmem [shape: f32[4,1,32], index: 16, kind: input, shape index: {}]   ;;  %s6349_s17 = inlined_call_operand.vmem [shape: f32[4,1,32], index: 17, kind: input, shape index: {}]   ;;  %s6350_s18 = inlined_call_operand.vmem [shape: f32[4,1,32], index: 18, kind: input, shape index: {}]   ;;  %s6351_s19 = inlined_call_operand.vmem [shape: bf16[32,16], index: 19, kind: input, shape index: {}]   ;;  %s6352_s20 = inlined_call_operand.vmem [shape: f32[1,16], index: 20, kind: input, shape index: {}]   ;;  %s6353_s21 = inlined_call_operand.hbm [shape: f32[16,16], index: 21, kind: output, shape index: {}]  }
   0x1   :  { %6361 = sst [smem:[#allocation11_spill]] %s6332_s0 }
   0x2   :  { %6362 = sst [smem:[#allocation12_spill]] %s6333_s1 }
   0x3   :  { %6363 = sst [smem:[#allocation13_spill]] %s6334_s2 }
   0x4   :  { %6364 = sst [smem:[#allocation14_spill]] %s6335_s3 }
   0x5   :  { %6365 = sst [smem:[#allocation15_spill]] %s6336_s4 }
   0x6   :  { %6366 = sst [smem:[#allocation16_spill]] %s6337_s5 }
   0x7   :  { %6367 = sst [smem:[#allocation17_spill]] %s6339_s7 }
   0x8   :  { %6368 = sst [smem:[#allocation18_spill]] %s6341_s9 }
   0x9   :  { %6369 = sst [smem:[#allocation19_spill]] %s6345_s13 }
   0xa   :  { %6370 = sst [smem:[#allocation20_spill]] %s6346_s14 }
   0xb   :  { %6371 = sst [smem:[#allocation21_spill]] %s6350_s18 }
   0xc   :  { %6372 = sst [smem:[#allocation22_spill]] %s6351_s19 }
   0xd   :  { %6373 = sst [smem:[#allocation23_spill]] %s6352_s20 }
   0xe   :  { %6374 = sst [smem:[#allocation24_spill]] %s6353_s21 }
   0xf   :  { %26 = vsyncpa [#allocation4], 0  ;;  %s5645_s2 = smov 0   ;;  %s5647_s25 = smov 0  }
  0x10   :  { %s5649_s26 = smov 0  }
  0x11 LB: > { %6375 = sst [smem:[#allocation6_spill]] %s5510_s2  ;;  %s41_s3 = sadd.s32 1, %s5514_s25  ;;  %s5518_s26 = sphi %s5649_s26, %s32_s26   ;;  %s5514_s25 = sphi %s5647_s25, %s6410_s25   ;;  %s5510_s2 = sphi %s5645_s2, %s6409_s2  }
  0x12   : > { %6376 = sst [smem:[#allocation7_spill]] %s5514_s25  ;;  %p42_p0 = scmp.ge.s32.totalorder %s41_s3, 4 }
  0x13   : > { %6377 = sst [smem:[#allocation8_spill]] %s5518_s26  ;;  %p4620_p1 = scmp.ge.s32.totalorder %s5518_s26, 1 }
  0x14   : > { %p742_p2 = scmp.lt.s32.totalorder %s5518_s26, 5  ;;  %s6412_s3 = smov (%p42_p0, %s41_s3), 0 }
  0x15   : > { %6378 = sst [smem:[#allocation9_spill]] %s6412_s3 }
  0x16   : > { %p743_p3 = pnand %p4620_p1, %p742_p2 }
  0x18   : > { %746 = sbr.rel (%p743_p3) target bundleno = 3220 (0xc94), region = 104 }
  0x1f   : > { %p864_p4 = scmp.lt.s32.totalorder %s5510_s2, 3  ;;  %s6380_s1 = sld [smem:[#allocation14_spill]] }
  0x20   : > { %s6381_s25 = sld [smem:[#allocation16_spill]]  ;;  %s6382_s7 = sld [smem:[#allocation17_spill]] }
  0x21   : > { %s5668_s28 = scalar_select %p864_p4, %s5510_s2, 3 }
  0x22   : > { %s6384_s9 = sld [smem:[#allocation18_spill]]  ;;  %s6385_s13 = sld [smem:[#allocation19_spill]] }
  0x23   : > { %s4852_s29 = sshll.u32 %s5668_s28, 4  ;;  %s6386_s14 = sld [smem:[#allocation20_spill]] }
  0x24   : > { %s918_s20 = scalar_lea.vmem %s6348_s16, %s5668_s28 }
  0x25   : > { %s5678_s24 = scalar_lea.vmem %s6380_s1, %s4852_s29 }
  0x26   : > { %s5683_s21 = scalar_lea.vmem %s6381_s25, %s4852_s29  ;;  %s5692_s0 = scalar_lea.vmem %s6382_s7, %s4852_s29 }
  0x27   : > { %6383 = sst [smem:[#allocation10_spill]] %s5692_s0  ;;  %s4856_s0 = sshll.u32 %s5668_s28, 8 }
  0x28   : > { %s5701_s27 = scalar_lea.vmem %s6384_s9, %s4852_s29  ;;  %s5719_s22 = scalar_lea.vmem %s6385_s13, %s4856_s0 }
  0x29   : > { %s5724_s9 = scalar_lea.vmem %s6386_s14, %s4852_s29  ;;  %s4857_s25 = sshll.u32 %s5668_s28, 10 }
  0x2a   : > { %s5734_s18 = scalar_lea.vmem %s6347_s15, %s4857_s25  ;;  %s921_s0 = scalar_lea.vmem %s6349_s17, %s5668_s28 }
  0x2b   : > { %s6387_s13 = sld [smem:[#allocation21_spill]]  ;;  %s6388_s29 = sld [smem:[#allocation6_spill]] }
  0x31   : > { %s924_s23 = scalar_lea.vmem %s6387_s13, %s5668_s28  ;;  %p4634_p5 = scmp.ne.s32.totalorder %s6388_s29, 0 }
  0x32   : > { %s6389_s5 = sld [smem:[#allocation12_spill]] (!%p4634_p5)  ;;  %v5520_v1 = vmov (!%p4634_p5), 0.0   ;;  %s6390_s3 = sld [smem:[#allocation11_spill]] (!%p4634_p5)  ;;  %vm5521_vm0 = vmmov (!%p4634_p5), 0   ;;  %vm949_vm1 = vcmask (!%p4634_p5), 130048   ;;  %vm994_vm2 = vcmask (!%p4634_p5), 261120  }
  0x33   : > { %930 = sbr.rel (%p4634_p5) target bundleno = 277 (0x115), region = 108  ;;  %5083 = vmatprep.subr.bf16.mxu0 (!%p4634_p5), %v5520_v1  ;;  %5085 = vmatprep.mubr.msk.bf16.mxu0 (!%p4634_p5), %vm5521_vm0, %v5520_v1  ;;  %s6391_s14 = sld [smem:[#allocation13_spill]] (!%p4634_p5) }
  0x38   : > { %v5270_v0 = vld [vmem:[%s6389_s5] sm:$0xff] (!%p4634_p5)   ;;  %v932_v3 = vld [vmem:[%s6390_s3 + $0x8] sm:$0xff] (!%p4634_p5) }
  0x39   : > { %v931_v2 = vld [vmem:[%s6390_s3] sm:$0xff] (!%p4634_p5)  ;;  %5084 = vmatpush3.bf16.msra.mxu0 (!%p4634_p5), %v5270_v0 }
  0x3a   : > { %v935_v4 = vpack.c.bf16 %v932_v3, %v931_v2  ;;  %v4635_v5 = vld [vmem:[%s6391_s14] ss:$0 sm:$0xff] }
  0x3c   : > { %5086 = vmatmul.mubr.msk.bf16.vlgmr.msra.gmra.mrb[0].mxu0 %vm949_vm1, %v935_v4 }
 0x10f   : > { %v987_v6 = vpop.f32.mrb[0].mxu0 }
 0x110   : > { %v988_v7 = vadd.f32 %v4635_v5, %v987_v6  ;;  %v5087_v8 = vpop.f32.mrb[1].mxu0 }
 0x111   : > { %v990_v9 = vpop.f32.mrb[2].mxu0 }
 0x112   : > { %995 = vst.msk [vmem:[#allocation2] sm:$0xff] %vm994_vm2, %v988_v7  ;;  %v991_v10 = vadd.f32 %v4635_v5, %v990_v9  ;;  %v5088_v11 = vpop.f32.mrb[3].mxu0 }
 0x114   : > { %996 = vst.msk [vmem:[#allocation2 + $0x8] sm:$0xff] %vm994_vm2, %v991_v10 }
 0x115 PF: > { %v5286_v12 = vld [vmem:[%s5683_s21] sm:$0xff]   ;;  %v5522_v13 = vmov 0.0   ;;  %v5288_v15 = vld [vmem:[%s5683_s21 + $0x8] sm:$0xff]   ;;  %vm5523_vm3 = vmmov 0   ;;  %vm1023_vm4 = vcmask 261120   ;;  %s6392_s4 = scalar_lea.vmem %s6338_s6, %s5668_s28  ;;  %s6393_s1 = sld [smem:[#allocation15_spill]] }
 0x116   : > { %5097 = vmatprep.subr.bf16.mxu1 %v5522_v13  ;;  %5089 = vmatprep.subr.bf16.mxu0 %v5522_v13  ;;  %v5287_v14 = vld [vmem:[%s5678_s24] sm:$0xff]   ;;  %v5289_v18 = vld [vmem:[%s5678_s24 + $0x8] sm:$0xff]   ;;  %vm1198_vm5 = vcmask 64512   ;;  %s5524_s19 = smov 112   ;;  %s5525_s25 = smov 120   ;;  %vm1262_vm6 = vcmask 1043456  }
 0x117   : > { %5098 = vmatpush3.bf16.msra.mxu1 %v5286_v12  ;;  %5101 = vmatprep.mubr.msk.bf16.mxu1 %vm5523_vm3, %v5522_v13  ;;  %v4642_v20 = vld [vmem:[%s6392_s4] ss:$0 sm:$0xff]  ;;  %s6395_s26 = sld [smem:[#allocation10_spill]]  ;;  %s5526_s7 = smov 104   ;;  %vm1655_vm7 = vcmask 130048   ;;  %vm1657_vm8 = vcmask 195584  }
 0x118   : > { %5099 = vmatprep.subr.bf16.mxu1 %v5522_v13  ;;  %5090 = vmatpush3.bf16.msra.mxu0 %v5287_v14  ;;  %s6396_s14 = scalar_lea.vmem %s6340_s8, %s5668_s28  ;;  %s5527_s21 = smov 8  }
 0x119   : > { %v997_v16 = vld [vmem:[#allocation2] sm:$0xff]  ;;  %5091 = vmatprep.subr.bf16.mxu0 %v5522_v13  ;;  %5093 = vmatprep.mubr.msk.bf16.mxu0 %vm5523_vm3, %v5522_v13  ;;  %s5528_s24 = smov 16   ;;  %s5529_s4 = smov 24  }
 0x11a   : > { %s6397_s29 = scalar_lea.vmem %s6342_s10, %s5668_s28 }
 0x11b   : > { %v998_v17 = vld [vmem:[#allocation2 + $0x8] sm:$0xff]  ;;  %5100 = vmatpush3.bf16.msra.mxu1 %v5288_v15  ;;  %s6394_s5 = scalar_lea.vmem %s6393_s1, %s5668_s28 }
 0x11c   : > { %v999_v19 = vpack.c.bf16 %v998_v17, %v997_v16  ;;  %5092 = vmatpush3.bf16.msra.mxu0 %v5289_v18  ;;  %5113 = vmatprep.subr.bf16.mxu1 %v5522_v13  ;;  %v4638_v21 = vld [vmem:[%s6394_s5] ss:$0 sm:$0xff] }
 0x11d   : > { %5105 = vmatprep.subr.bf16.mxu0 %v5522_v13  ;;  %v5290_v39 = vld [vmem:[%s6395_s26] sm:$0xff]   ;;  %v5291_v40 = vld [vmem:[%s6395_s26 + $0x8] sm:$0xff]  }
 0x11e   : > { %5102 = vmatmul.mubr.msk.bf16.vlgmr.msra.gmra.mrb[0].mxu1 %vm1023_vm4, %v999_v19 }
 0x11f   : > { %5094 = vmatmul.mubr.msk.bf16.vlgmr.msra.gmra.mrb[0].mxu0 %vm1023_vm4, %v999_v19  ;;  %5115 = vmatprep.mubr.msk.bf16.mxu1 %vm5523_vm3, %v5522_v13 }
 0x120   : > { %5109 = vmatprep.mubr.msk.bf16.mxu0 %vm5523_vm3, %v5522_v13  ;;  %5106 = vmatpush3.bf16.msra.mxu0 %v5290_v39 }
 0x121   : > { %5107 = vmatprep.subr.bf16.mxu0 %v5522_v13 }
 0x124   : > { %5108 = vmatpush3.bf16.msra.mxu0 %v5291_v40 }
 0x125   : > { %5119 = vmatprep.subr.bf16.mxu0 %v5522_v13 }
 0x127   : > { %5110 = vmatmul.mubr.msk.bf16.vlgmr.msra.gmra.mrb[4].mxu0 %vm1023_vm4, %v999_v19 }
 0x128   : > { %5121 = vmatprep.mubr.msk.bf16.mxu0 %vm5523_vm3, %v5522_v13 }
 0x1f1   : > { %v1125_v22 = vpop.f32.mrb[0].mxu1 }
 0x1f2   : > { %v1126_v23 = vadd.f32 %v4642_v20, %v1125_v22  ;;  %v5103_v24 = vpop.f32.mrb[1].mxu1  ;;  %v1061_v25 = vpop.f32.mrb[0].mxu0 }
 0x1f3   : > { %v1128_v26 = vpop.f32.mrb[2].mxu1  ;;  %v1062_v27 = vadd.f32 %v4638_v21, %v1061_v25  ;;  %v5095_v28 = vpop.f32.mrb[1].mxu0 }
 0x1f4   : > { %v1197_v29 = vpack.c.bf16 %v1126_v23, %v1126_v23  ;;  %v5104_v30 = vpop.f32.mrb[3].mxu1  ;;  %v1064_v31 = vpop.f32.mrb[2].mxu0  ;;  %v1129_v35 = vadd.f32 %v4642_v20, %v1128_v26 }
 0x1f5   : > { %v5096_v32 = vpop.f32.mrb[3].mxu0  ;;  %v1196_v33 = vpack.c.bf16 %v1062_v27, %v1062_v27  ;;  %v1065_v36 = vadd.f32 %v4638_v21, %v1064_v31 }
 0x1f6   : > { %1422 = vrot.lane.b32.xlu1 %v1197_v29, %s5524_s19  ;;  %1310 = vrot.lane.b32.xlu0 %v1197_v29, %s5525_s25  ;;  %v1203_v34 = vsel %vm1198_vm5, %v1197_v29, 0  ;;  %v1660_v37 = vpack.c.bf16 %v1129_v35, %v1129_v35 }
 0x1f7   : > { %5114 = vmatpush3.bf16.xpose.msra.mxu1 %v1203_v34  ;;  %v1659_v38 = vpack.c.bf16 %v1065_v36, %v1065_v36 }
 0x1f8   : > { %5125 = vmatprep.subr.bf16.mxu1 %v5522_v13  ;;  %v1665_v50 = vsel %vm1198_vm5, %v1660_v37, 0 }
 0x1fa   : > { %1420 = vrot.lane.b32.xlu1 %v1196_v33, %s5524_s19  ;;  %1307 = vrot.lane.b32.xlu0 %v1196_v33, %s5525_s25 }
 0x1fe   : > { %1531 = vrot.lane.b32.xlu1 %v1196_v33, %s5526_s7  ;;  %1533 = vrot.lane.b32.xlu0 %v1197_v29, %s5526_s7 }
 0x1ff   : > { %5116 = vmatmul.mubr.msk.bf16.vlgmr.msra.gmra.mrb[4].mxu1 %vm1198_vm5, %v1196_v33 }
 0x200   : > { %5127 = vmatprep.mubr.msk.bf16.mxu1 %vm5523_vm3, %v5522_v13 }
 0x202   : > { %1771 = vrot.lane.b32.xlu0 %v1660_v37, %s5525_s25  ;;  %1768 = vrot.lane.b32.xlu1 %v1659_v38, %s5525_s25 }
 0x206   : > { %1883 = vrot.lane.b32.xlu0 %v1660_v37, %s5524_s19  ;;  %1881 = vrot.lane.b32.xlu1 %v1659_v38, %s5524_s19 }
 0x20a   : > { %1994 = vrot.lane.b32.xlu0 %v1660_v37, %s5526_s7  ;;  %1992 = vrot.lane.b32.xlu1 %v1659_v38, %s5526_s7 }
 0x268   : > { %v1311_v41 = vpop.permute.xlu0 %1310  ;;  %v1423_v43 = vpop.permute.xlu1 %1422 }
 0x269   : > { %v1316_v42 = vsel %vm1198_vm5, %v1311_v41, 0  ;;  %v1428_v45 = vsel %vm1198_vm5, %v1423_v43, 0 }
 0x26a   : > { %5126 = vmatpush3.bf16.xpose.msra.mxu1 %v1316_v42 }
 0x26b   : > { %5137 = vmatprep.subr.bf16.mxu1 %v5522_v13 }
 0x26c   : > { %v1308_v44 = vpop.permute.xlu0 %1307  ;;  %v1421_v47 = vpop.permute.xlu1 %1420 }
 0x270   : > { %v1534_v46 = vpop.permute.xlu0 %1533  ;;  %v1532_v49 = vpop.permute.xlu1 %1531 }
 0x271   : > { %5128 = vmatmul.mubr.msk.bf16.vlgmr.msra.gmra.mrb[8].mxu1 %vm1198_vm5, %v1308_v44  ;;  %v1539_v48 = vsel %vm1198_vm5, %v1534_v46, 0 }
 0x272   : > { %5138 = vmatpush3.bf16.xpose.msra.mxu1 %v1428_v45  ;;  %5139 = vmatprep.mubr.msk.bf16.mxu1 %vm5523_vm3, %v5522_v13 }
 0x273   : > { %5149 = vmatprep.subr.bf16.mxu1 %v5522_v13 }
 0x274   : > { %v1772_v51 = vpop.permute.xlu0 %1771  ;;  %v1769_v54 = vpop.permute.xlu1 %1768 }
 0x275   : > { %v1777_v52 = vsel %vm1198_vm5, %v1772_v51, 0 }
 0x278   : > { %v1884_v53 = vpop.permute.xlu0 %1883  ;;  %v1882_v57 = vpop.permute.xlu1 %1881 }
 0x279   : > { %5140 = vmatmul.mubr.msk.bf16.vlgmr.msra.gmra.mrb[12].mxu1 %vm1198_vm5, %v1421_v47  ;;  %v1889_v55 = vsel %vm1198_vm5, %v1884_v53, 0 }
 0x27a   : > { %5150 = vmatpush3.bf16.xpose.msra.mxu1 %v1539_v48  ;;  %5151 = vmatprep.mubr.msk.bf16.mxu1 %vm5523_vm3, %v5522_v13 }
 0x27b   : > { %5161 = vmatprep.subr.bf16.mxu1 %v5522_v13 }
 0x27c   : > { %v1995_v56 = vpop.permute.xlu0 %1994  ;;  %v1993_v59 = vpop.permute.xlu1 %1992 }
 0x27d   : > { %v2000_v58 = vsel %vm1198_vm5, %v1995_v56, 0 }
 0x281   : > { %5152 = vmatmul.mubr.msk.bf16.vlgmr.msra.gmra.mrb[16].mxu1 %vm1198_vm5, %v1532_v49 }
 0x282   : > { %5162 = vmatpush3.bf16.xpose.msra.mxu1 %v1665_v50  ;;  %5163 = vmatprep.mubr.msk.bf16.mxu1 %vm5523_vm3, %v5522_v13  ;;  %v1189_v50 = vpop.f32.mrb[4].mxu0 }
 0x283   : > { %5173 = vmatprep.subr.bf16.mxu1 %v5522_v13  ;;  %v5111_v51 = vpop.f32.mrb[5].mxu0 }
 0x284   : > { %v1192_v53 = vpop.f32.mrb[6].mxu0 }
 0x285   : > { %v5112_v56 = vpop.f32.mrb[7].mxu0 }
 0x289   : > { %5164 = vmatmul.mubr.msk.bf16.vlgmr.msra.gmra.mrb[20].mxu1 %vm1198_vm5, %v1659_v38 }
 0x28a   : > { %5174 = vmatpush3.bf16.xpose.msra.mxu1 %v1777_v52  ;;  %5175 = vmatprep.mubr.msk.bf16.mxu1 %vm5523_vm3, %v5522_v13  ;;  %v4646_v52 = vld [vmem:[%s6396_s14] ss:$0 sm:$0xff] }
 0x28b   : > { %5185 = vmatprep.subr.bf16.mxu1 %v5522_v13 }
 0x291   : > { %5176 = vmatmul.mubr.msk.bf16.vlgmr.msra.gmra.mrb[24].mxu1 %vm1198_vm5, %v1769_v54  ;;  %v1190_v54 = vadd.f32 %v4646_v52, %v1189_v50 }
 0x292   : > { %5186 = vmatpush3.bf16.xpose.msra.mxu1 %v1889_v55  ;;  %5187 = vmatprep.mubr.msk.bf16.mxu1 %vm5523_vm3, %v5522_v13  ;;  %v5881_v55 = vadd.f32 %v4646_v52, %v1192_v53 }
 0x293   : > { %5197 = vmatprep.subr.bf16.mxu1 %v5522_v13 }
 0x299   : > { %5188 = vmatmul.mubr.msk.bf16.vlgmr.msra.gmra.mrb[28].mxu1 %vm1198_vm5, %v1882_v57  ;;  %v1258_v57 = vpack.c.bf16 %v1190_v54, %v1190_v54 }
 0x29a   : > { %5198 = vmatpush3.bf16.xpose.msra.mxu1 %v2000_v58  ;;  %5199 = vmatprep.mubr.msk.bf16.mxu1 %vm5523_vm3, %v5522_v13 }
 0x29b   : > { %5209 = vmatprep.subr.bf16.mxu1 %v5522_v13  ;;  %v1264_v58 = vsel %vm1262_vm6, %v1258_v57, 0 }
 0x29c   : > { %5120 = vmatpush3.bf16.msra.mxu0 %v1264_v58 }
 0x29d   : > { %5131 = vmatprep.subr.bf16.mxu0 %v5522_v13 }
 0x2a1   : > { %5200 = vmatmul.mubr.msk.bf16.vlgmr.msra.gmra.mrb[32].mxu1 %vm1198_vm5, %v1993_v59 }
 0x2a2   : > { %5213 = vmatprep.mubr.msk.bf16.mxu1 %vm5523_vm3, %v5522_v13 }
 0x2d2   : > { %v1239_v60 = vpop.f32.mrb[4].mxu1 }
 0x2d3   : > { %v1245_v61 = vmul.f32 0.35355338, %v1239_v60  ;;  %v5117_v62 = vpop.f32.mrb[5].mxu1 }
 0x2d4   : > { %v1242_v63 = vpop.f32.mrb[6].mxu1 }
 0x2d5   : > { %v5118_v0 = vpop.f32.mrb[7].mxu1  ;;  %v1246_v1 = vsel %vm1198_vm5, %v1245_v61, -inf }
 0x2d6   : > { %1247 = vmax.xlane.f32.xlu0 %v1246_v1 }
 0x344   : > { %v1352_v2 = vpop.f32.mrb[8].mxu1 }
 0x345   : > { %v5847_v3 = vmul.f32 0.35355338, %v1352_v2  ;;  %v5129_v4 = vpop.f32.mrb[9].mxu1 }
 0x346   : > { %v1355_v5 = vpop.f32.mrb[10].mxu1 }
 0x347   : > { %v5130_v6 = vpop.f32.mrb[11].mxu1  ;;  %v1359_v7 = vsel %vm1198_vm5, %v5847_v3, -inf }
 0x348   : > { %1360 = vmax.xlane.f32.xlu1 %v1359_v7 }
 0x34c   : > { %v1464_v8 = vpop.f32.mrb[12].mxu1 }
 0x34d   : > { %v5851_v9 = vmul.f32 0.35355338, %v1464_v8  ;;  %v5141_v10 = vpop.f32.mrb[13].mxu1 }
 0x34e   : > { %v1467_v11 = vpop.f32.mrb[14].mxu1 }
 0x34f   : > { %v5142_v12 = vpop.f32.mrb[15].mxu1  ;;  %v1471_v14 = vsel %vm1198_vm5, %v5851_v9, -inf }
 0x350   : > { %1472 = vmax.xlane.f32.xlu0 %v1471_v14 }
 0x354   : > { %v1575_v15 = vpop.f32.mrb[16].mxu1 }
 0x355   : > { %v5855_v16 = vmul.f32 0.35355338, %v1575_v15  ;;  %v5153_v17 = vpop.f32.mrb[17].mxu1 }
 0x356   : > { %v1578_v18 = vpop.f32.mrb[18].mxu1 }
 0x357   : > { %v5154_v19 = vpop.f32.mrb[19].mxu1  ;;  %v1582_v20 = vsel %vm1198_vm5, %v5855_v16, -inf }
 0x358   : > { %1583 = vmax.xlane.f32.xlu0 %v1582_v20 }
 0x35c   : > { %v1701_v21 = vpop.f32.mrb[20].mxu1 }
 0x35d   : > { %v5859_v22 = vmul.f32 0.35355338, %v1701_v21  ;;  %v5165_v23 = vpop.f32.mrb[21].mxu1 }
 0x35e   : > { %v1704_v24 = vpop.f32.mrb[22].mxu1 }
 0x35f   : > { %v5166_v25 = vpop.f32.mrb[23].mxu1  ;;  %v1708_v26 = vsel %vm1198_vm5, %v5859_v22, -inf }
 0x360   : > { %1709 = vmax.xlane.f32.xlu1 %v1708_v26 }
 0x363   : > { %v1248_v27 = vpop.xlane.xlu0 %1247 }
 0x364   : > { %v1249_v28 = vsub.f32 %v1245_v61, %v1248_v27  ;;  %v1813_v29 = vpop.f32.mrb[24].mxu1 }
 0x365   : > { %v5863_v30 = vmul.f32 0.35355338, %v1813_v29  ;;  %v5177_v31 = vpop.f32.mrb[25].mxu1 }
 0x366   : > { %v1250_v32 = vmul.f32 1.442695, %v1249_v28  ;;  %v1816_v33 = vpop.f32.mrb[26].mxu1 }
 0x367   : > { %v5178_v34 = vpop.f32.mrb[27].mxu1  ;;  %v1820_v35 = vsel %vm1198_vm5, %v5863_v30, -inf }
 0x368   : > { %5422 = vpow2.f32 %v1250_v32  ;;  %1821 = vmax.xlane.f32.xlu0 %v1820_v35  ;;  %v1720_v35 = vpack.c.bf16 %v5881_v55, %v5881_v55 }
 0x36a   : > { %v1725_v54 = vsel %vm1262_vm6, %v1720_v35, 0 }
 0x36c   : > { %v1925_v36 = vpop.f32.mrb[28].mxu1 }
 0x36d   : > { %v5867_v37 = vmul.f32 0.35355338, %v1925_v36  ;;  %v5189_v38 = vpop.f32.mrb[29].mxu1 }
 0x36e   : > { %v1928_v39 = vpop.f32.mrb[30].mxu1 }
 0x36f   : > { %v5190_v40 = vpop.f32.mrb[31].mxu1  ;;  %v1932_v41 = vsel %vm1198_vm5, %v5867_v37, -inf }
 0x370   : > { %1933 = vmax.xlane.f32.xlu1 %v1932_v41 }
 0x372   : > { %v5423_v42 = vpop.eup %5422 }
 0x373   : > { %v1252_v43 = vsel %vm1198_vm5, %v5423_v42, 0.0 }
 0x374   : > { %1253 = vadd.xlane.f32.xlu1 %v1252_v43  ;;  %v2036_v44 = vpop.f32.mrb[32].mxu1 }
 0x375   : > { %v5872_v45 = vmul.f32 0.35355338, %v2036_v44  ;;  %v5201_v46 = vpop.f32.mrb[33].mxu1 }
 0x376   : > { %v2039_v47 = vpop.f32.mrb[34].mxu1 }
 0x377   : > { %v5202_v48 = vpop.f32.mrb[35].mxu1  ;;  %v2043_v49 = vsel %vm1198_vm5, %v5872_v45, -inf }
 0x378   : > { %2044 = vmax.xlane.f32.xlu0 %v2043_v49 }
 0x3d5   : > { %v1361_v59 = vpop.xlane.xlu1 %1360 }
 0x3d6   : > { %v1362_v60 = vsub.f32 %v5847_v3, %v1361_v59 }
 0x3d8   : > { %v1363_v61 = vmul.f32 1.442695, %v1362_v60 }
 0x3da   : > { %5424 = vpow2.f32 %v1363_v61 }
 0x3dd   : > { %v1473_v62 = vpop.xlane.xlu0 %1472 }
 0x3de   : > { %v1474_v63 = vsub.f32 %v5851_v9, %v1473_v62 }
 0x3e0   : > { %v1475_v0 = vmul.f32 1.442695, %v1474_v63 }
 0x3e2   : > { %5426 = vpow2.f32 %v1475_v0 }
 0x3e4   : > { %v5425_v1 = vpop.eup %5424 }
 0x3e5   : > { %v1584_v2 = vpop.xlane.xlu0 %1583  ;;  %v1365_v4 = vsel %vm1198_vm5, %v5425_v1, 0.0 }
 0x3e6   : > { %v1585_v5 = vsub.f32 %v5855_v16, %v1584_v2  ;;  %1366 = vadd.xlane.f32.xlu0 %v1365_v4 }
 0x3e8   : > { %v1586_v6 = vmul.f32 1.442695, %v1585_v5 }
 0x3ea   : > { %5428 = vpow2.f32 %v1586_v6 }
 0x3ec   : > { %v5889_v7 = vpop.eup %5426 }
 0x3ed   : > { %v1477_v3 = vsel %vm1198_vm5, %v5889_v7, 0.0  ;;  %v1710_v10 = vpop.xlane.xlu1 %1709 }
 0x3ee   : > { %1478 = vadd.xlane.f32.xlu1 %v1477_v3  ;;  %v1711_v17 = vsub.f32 %v5859_v22, %v1710_v10 }
 0x3f0   : > { %v1712_v20 = vmul.f32 1.442695, %v1711_v17 }
 0x3f4   : > { %v5893_v8 = vpop.eup %5428 }
 0x3f5   : > { %v1588_v9 = vsel %vm1198_vm5, %v5893_v8, 0.0  ;;  %v1822_v18 = vpop.xlane.xlu0 %1821 }
 0x3f6   : > { %1589 = vadd.xlane.f32.xlu0 %v1588_v9  ;;  %v1823_v19 = vsub.f32 %v5863_v30, %v1822_v18 }
 0x3f8   : > { %v1824_v24 = vmul.f32 1.442695, %v1823_v19 }
 0x3fd   : > { %v1934_v11 = vpop.xlane.xlu1 %1933 }
 0x3fe   : > { %v1935_v21 = vsub.f32 %v5867_v37, %v1934_v11 }
 0x3ff   : > { %1483 = vrot.lane.b32.xlu1 %v1258_v57, %s5524_s19 }
 0x400   : > { %v1936_v25 = vmul.f32 1.442695, %v1935_v21 }
 0x401   : > { %v1254_v12 = vpop.xlane.xlu1 %1253 }
 0x402   : > { %5430 = vrcp.f32 %v1254_v12 }
 0x403   : > { %1594 = vrot.lane.b32.xlu1 %v1258_v57, %s5526_s7  ;;  %5432 = vpow2.f32 %v1712_v20 }
 0x404   : > { %5434 = vpow2.f32 %v1824_v24 }
 0x405   : > { %v2045_v23 = vpop.xlane.xlu0 %2044  ;;  %5436 = vpow2.f32 %v1936_v25 }
 0x406   : > { %v2046_v26 = vsub.f32 %v5872_v45, %v2045_v23 }
 0x408   : > { %v2047_v22 = vmul.f32 1.442695, %v2046_v26 }
 0x40a   : > { %5438 = vpow2.f32 %v2047_v22 }
 0x40c   : > { %1372 = vrot.lane.b32.xlu0 %v1258_v57, %s5525_s25  ;;  %v5431_v14 = vpop.eup %5430 }
 0x40d   : > { %v1256_v15 = vmul.f32 %v5431_v14, %v5423_v42  ;;  %v5433_v27 = vpop.eup %5432 }
 0x40e   : > { %v5907_v28 = vpop.eup %5434  ;;  %v1714_v29 = vsel %vm1198_vm5, %v5433_v27, 0.0 }
 0x40f   : > { %v1257_v16 = vpack.c.bf16 %v1256_v15, %v1256_v15  ;;  %v5910_v31 = vpop.eup %5436  ;;  %v1826_v30 = vsel %vm1198_vm5, %v5907_v28, 0.0 }
 0x410   : > { %v1938_v32 = vsel %vm1198_vm5, %v5910_v31, 0.0 }
 0x411   : > { %5122 = vmatmul.mubr.msk.bf16.vlgmr.msra.gmra.mrb[8].mxu0 %vm1198_vm5, %v1257_v16 }
 0x412   : > { %5133 = vmatprep.mubr.msk.bf16.mxu0 %vm5523_vm3, %v5522_v13 }
 0x414   : > { %v5916_v33 = vpop.eup %5438 }
 0x415   : > { %v2049_v34 = vsel %vm1198_vm5, %v5916_v33, 0.0 }
 0x427   : > { %1715 = vadd.xlane.f32.xlu1 %v1714_v29 }
 0x42b   : > { %1827 = vadd.xlane.f32.xlu1 %v1826_v30  ;;  %1939 = vadd.xlane.f32.xlu0 %v1938_v32 }
 0x42f   : > { %2050 = vadd.xlane.f32.xlu1 %v2049_v34 }
 0x440   : > { %1944 = vrot.lane.b32.xlu1 %v1720_v35, %s5524_s19  ;;  %s6398_s19 = scalar_lea.vmem %s6343_s11, %s5668_s28 }
 0x441   : > { %1833 = vrot.lane.b32.xlu0 %v1720_v35, %s5525_s25 }
 0x445   : > { %2055 = vrot.lane.b32.xlu0 %v1720_v35, %s5526_s7  ;;  %v5292_v35 = vld [vmem:[%s5701_s27] sm:$0xff]   ;;  %s6399_s7 = scalar_lea.vmem %s6344_s12, %s5668_s28 }
 0x446   : > { %5210 = vmatpush3.bf16.msra.mxu1 %v5292_v35  ;;  %v2257_v35 = vld [vmem:[%s5719_s22 + $0xc0] sm:$0xff] }
 0x447   : > { %5211 = vmatprep.subr.bf16.mxu1 %v5522_v13 }
 0x473   : > { %v1367_v36 = vpop.xlane.xlu0 %1366 }
 0x474   : > { %5440 = vrcp.f32 %v1367_v36 }
 0x47b   : > { %v1479_v37 = vpop.xlane.xlu1 %1478 }
 0x47c   : > { %5442 = vrcp.f32 %v1479_v37 }
 0x47e   : > { %v5441_v38 = vpop.eup %5440 }
 0x47f   : > { %v1369_v40 = vmul.f32 %v5441_v38, %v5425_v1  ;;  %v1484_v43 = vpop.permute.xlu1 %1483 }
 0x480   : > { %v1489_v46 = vsel %vm1262_vm6, %v1484_v43, 0 }
 0x481   : > { %v1370_v44 = vpack.c.bf16 %v1369_v40, %v1369_v40  ;;  %v5293_v40 = vld [vmem:[%s5701_s27 + $0x8] sm:$0xff]  }
 0x482   : > { %5212 = vmatpush3.bf16.msra.mxu1 %v5293_v40 }
 0x483   : > { %v1590_v39 = vpop.xlane.xlu0 %1589  ;;  %v1595_v48 = vpop.permute.xlu1 %1594 }
 0x484   : > { %5444 = vrcp.f32 %v1590_v39  ;;  %v1600_v51 = vsel %vm1262_vm6, %v1595_v48, 0 }
 0x486   : > { %v5443_v45 = vpop.eup %5442 }
 0x487   : > { %v1373_v41 = vpop.permute.xlu0 %1372  ;;  %v1481_v47 = vmul.f32 %v5443_v45, %v5889_v7 }
 0x488   : > { %v1378_v42 = vsel %vm1262_vm6, %v1373_v41, 0 }
 0x489   : > { %5132 = vmatpush3.bf16.msra.mxu0 %v1378_v42  ;;  %v1482_v49 = vpack.c.bf16 %v1481_v47, %v1481_v47 }
 0x48a   : > { %5143 = vmatprep.subr.bf16.mxu0 %v5522_v13 }
 0x48c   : > { %5134 = vmatmul.mubr.msk.bf16.vlgmr.msra.gmra.mrb[12].mxu0 %vm1198_vm5, %v1370_v44 }
 0x48d   : > { %5144 = vmatpush3.bf16.msra.mxu0 %v1489_v46  ;;  %5145 = vmatprep.mubr.msk.bf16.mxu0 %vm5523_vm3, %v5522_v13 }
 0x48e   : > { %5155 = vmatprep.subr.bf16.mxu0 %v5522_v13  ;;  %v5445_v50 = vpop.eup %5444 }
 0x48f   : > { %v1592_v52 = vmul.f32 %v5445_v50, %v5893_v8 }
 0x491   : > { %v1593_v53 = vpack.c.bf16 %v1592_v52, %v1592_v52 }
 0x494   : > { %5146 = vmatmul.mubr.msk.bf16.vlgmr.msra.gmra.mrb[16].mxu0 %vm1198_vm5, %v1482_v49 }
 0x495   : > { %5156 = vmatpush3.bf16.msra.mxu0 %v1600_v51  ;;  %5157 = vmatprep.mubr.msk.bf16.mxu0 %vm5523_vm3, %v5522_v13 }
 0x496   : > { %5167 = vmatprep.subr.bf16.mxu0 %v5522_v13 }
 0x49c   : > { %5158 = vmatmul.mubr.msk.bf16.vlgmr.msra.gmra.mrb[20].mxu0 %vm1198_vm5, %v1593_v53 }
 0x49d   : > { %5168 = vmatpush3.bf16.msra.mxu0 %v1725_v54  ;;  %5169 = vmatprep.mubr.msk.bf16.mxu0 %vm5523_vm3, %v5522_v13 }
 0x49e   : > { %5179 = vmatprep.subr.bf16.mxu0 %v5522_v13 }
 0x4b4   : > { %v1716_v55 = vpop.xlane.xlu1 %1715 }
 0x4b5   : > { %5446 = vrcp.f32 %v1716_v55 }
 0x4b8   : > { %v1828_v56 = vpop.xlane.xlu1 %1827  ;;  %v1940_v57 = vpop.xlane.xlu0 %1939 }
 0x4b9   : > { %5448 = vrcp.f32 %v1828_v56 }
 0x4ba   : > { %5450 = vrcp.f32 %v1940_v57 }
 0x4bc   : > { %v1834_v60 = vpop.permute.xlu0 %1833  ;;  %v2051_v63 = vpop.xlane.xlu1 %2050 }
 0x4bd   : > { %v1839_v0 = vsel %vm1262_vm6, %v1834_v60, 0  ;;  %5452 = vrcp.f32 %v2051_v63 }
 0x4bf   : > { %v5447_v58 = vpop.eup %5446 }
 0x4c0   : > { %v1718_v59 = vmul.f32 %v5447_v58, %v5433_v27  ;;  %v1945_v2 = vpop.permute.xlu1 %1944  ;;  %v2056_v3 = vpop.permute.xlu0 %2055 }
 0x4c1   : > { %v1950_v6 = vsel %vm1262_vm6, %v1945_v2, 0  ;;  %v2061_v10 = vsel %vm1262_vm6, %v2056_v3, 0  ;;  %v4666_v2 = vld [vmem:[%s6397_s29] ss:$0 sm:$0xff] }
 0x4c2   : > { %v1719_v61 = vpack.c.bf16 %v1718_v59, %v1718_v59 }
 0x4c3   : > { %v5449_v62 = vpop.eup %5448 }
 0x4c4   : > { %5170 = vmatmul.mubr.msk.bf16.vlgmr.msra.gmra.mrb[24].mxu0 %vm1198_vm5, %v1719_v61  ;;  %v1830_v1 = vmul.f32 %v5449_v62, %v5907_v28  ;;  %v5451_v5 = vpop.eup %5450 }
 0x4c5   : > { %5180 = vmatpush3.bf16.msra.mxu0 %v1839_v0  ;;  %5181 = vmatprep.mubr.msk.bf16.mxu0 %vm5523_vm3, %v5522_v13  ;;  %v1942_v7 = vmul.f32 %v5451_v5, %v5910_v31 }
 0x4c6   : > { %5191 = vmatprep.subr.bf16.mxu0 %v5522_v13  ;;  %v1831_v4 = vpack.c.bf16 %v1830_v1, %v1830_v1 }
 0x4c7   : > { %v1943_v8 = vpack.c.bf16 %v1942_v7, %v1942_v7  ;;  %v5453_v9 = vpop.eup %5452 }
 0x4c8   : > { %v2053_v11 = vmul.f32 %v5453_v9, %v5916_v33  ;;  %v5462_v9 = vld [vmem:[#allocation2] sm:$0xff] }
 0x4ca   : > { %v2054_v12 = vpack.c.bf16 %v2053_v11, %v2053_v11 }
 0x4cc   : > { %5182 = vmatmul.mubr.msk.bf16.vlgmr.msra.gmra.mrb[28].mxu0 %vm1198_vm5, %v1831_v4 }
 0x4cd   : > { %5192 = vmatpush3.bf16.msra.mxu0 %v1950_v6  ;;  %5193 = vmatprep.mubr.msk.bf16.mxu0 %vm5523_vm3, %v5522_v13 }
 0x4ce   : > { %5203 = vmatprep.subr.bf16.mxu0 %v5522_v13 }
 0x4d4   : > { %5194 = vmatmul.mubr.msk.bf16.vlgmr.msra.gmra.mrb[32].mxu0 %vm1198_vm5, %v1943_v8 }
 0x4d5   : > { %5204 = vmatpush3.bf16.msra.mxu0 %v2061_v10  ;;  %5205 = vmatprep.mubr.msk.bf16.mxu0 %vm5523_vm3, %v5522_v13 }
 0x4dc   : > { %5206 = vmatmul.mubr.msk.bf16.vlgmr.msra.gmra.mrb[36].mxu0 %vm1198_vm5, %v2054_v12  ;;  %v5463_v12 = vld [vmem:[#allocation2 + $0x8] sm:$0xff] }
 0x4e4   : > { %v1300_v14 = vpop.f32.mrb[8].mxu0 }
 0x4e5   : > { %v5123_v15 = vpop.f32.mrb[9].mxu0 }
 0x4e6   : > { %v1303_v16 = vpop.f32.mrb[10].mxu0 }
 0x4e7   : > { %v5124_v17 = vpop.f32.mrb[11].mxu0 }
 0x55f   : > { %v1414_v18 = vpop.f32.mrb[12].mxu0 }
 0x560   : > { %v5135_v19 = vpop.f32.mrb[13].mxu0 }
 0x561   : > { %v1417_v20 = vpop.f32.mrb[14].mxu0 }
 0x562   : > { %v5136_v21 = vpop.f32.mrb[15].mxu0 }
 0x567   : > { %v1525_v23 = vpop.f32.mrb[16].mxu0 }
 0x568   : > { %v5147_v24 = vpop.f32.mrb[17].mxu0 }
 0x569   : > { %v1528_v25 = vpop.f32.mrb[18].mxu0 }
 0x56a   : > { %v5148_v26 = vpop.f32.mrb[19].mxu0 }
 0x56f   : > { %v1636_v22 = vpop.f32.mrb[20].mxu0 }
 0x570   : > { %v5159_v27 = vpop.f32.mrb[21].mxu0 }
 0x571   : > { %v1639_v28 = vpop.f32.mrb[22].mxu0  ;;  %v2241_v27 = vld [vmem:[%s5719_s22 + $0x40] sm:$0xff] }
 0x572   : > { %v5160_v29 = vpop.f32.mrb[23].mxu0  ;;  %v2234_v28 = vld [vmem:[%s5719_s22 + $0x8] sm:$0xff] }
 0x597   : > { %v1761_v31 = vpop.f32.mrb[24].mxu0 }
 0x598   : > { %v5171_v30 = vpop.f32.mrb[25].mxu0 }
 0x599   : > { %v1764_v32 = vpop.f32.mrb[26].mxu0 }
 0x59a   : > { %v5172_v33 = vpop.f32.mrb[27].mxu0 }
 0x59f   : > { %v1875_v34 = vpop.f32.mrb[28].mxu0 }
 0x5a0   : > { %v5271_v36 = vpack.i.bf16 %v1875_v34, %v1414_v18  ;;  %v5183_v37 = vpop.f32.mrb[29].mxu0  ;;  %v2249_v34 = vld [vmem:[%s5719_s22 + $0x80] sm:$0xff] }
 0x5a1   : > { %v1878_v38 = vpop.f32.mrb[30].mxu0  ;;  %v4689_v37 = vcombine.high %v2249_v34, %v2257_v35 }
 0x5a2   : > { %5272 = vrot.lane.b32.xlu0 %v5271_v36, %s5527_s21  ;;  %v5184_v39 = vpop.f32.mrb[31].mxu0  ;;  %v2250_v36 = vld [vmem:[%s5719_s22 + $0x88] sm:$0xff] }
 0x5a3   : > { %v2258_v38 = vld [vmem:[%s5719_s22 + $0xc8] sm:$0xff]  ;;  %v4688_v39 = vcombine.low %v2249_v34, %v2257_v35  ;;  %v2255_v34 = vld [vmem:[%s5719_s22 + $0xb0] sm:$0xff] }
 0x5a4   : > { %v4690_v40 = vcombine.low %v2250_v36, %v2258_v38  ;;  %v2263_v35 = vld [vmem:[%s5719_s22 + $0xf0] sm:$0xff] }
 0x5a7   : > { %v1986_v41 = vpop.f32.mrb[32].mxu0 }
 0x5a8   : > { %v5276_v42 = vpack.i.bf16 %v1986_v41, %v1525_v23  ;;  %v5195_v43 = vpop.f32.mrb[33].mxu0  ;;  %v4691_v41 = vcombine.high %v2250_v36, %v2258_v38  ;;  %v2256_v36 = vld [vmem:[%s5719_s22 + $0xb8] sm:$0xff] }
 0x5a9   : > { %v1989_v44 = vpop.f32.mrb[34].mxu0  ;;  %v2243_v43 = vld [vmem:[%s5719_s22 + $0x50] sm:$0xff] }
 0x5aa   : > { %5277 = vrot.lane.b32.xlu1 %v5276_v42, %s5528_s24  ;;  %v5196_v45 = vpop.f32.mrb[35].mxu0  ;;  %v2235_v42 = vld [vmem:[%s5719_s22 + $0x10] sm:$0xff]  ;;  %v2236_v44 = vld [vmem:[%s5719_s22 + $0x18] sm:$0xff]  ;;  %s6401_s24 = sld [smem:[#allocation6_spill]] }
 0x5ab   : > { %v5530_v45 = vmov 0  }
 0x5ac   : > { %2545 = vmatprep.mubr.bf16.mxu0 %v5530_v45 }
 0x5af   : > { %v2097_v46 = vpop.f32.mrb[36].mxu0 }
 0x5b0   : > { %v5281_v47 = vpack.i.bf16 %v2097_v46, %v1636_v22  ;;  %v5207_v48 = vpop.f32.mrb[37].mxu0  ;;  %v2233_v22 = vld [vmem:[%s5719_s22] sm:$0xff]  ;;  %v4677_v46 = vcombine.high %v2235_v42, %v2243_v43  ;;  %p4843_p6 = scmp.ne.s32.totalorder %s6401_s24, 3 }
 0x5b1   : > { %v2100_v49 = vpop.f32.mrb[38].mxu0  ;;  %v4673_v29 = vcombine.high %v2233_v22, %v2241_v27  ;;  %v4672_v30 = vcombine.low %v2233_v22, %v2241_v27  ;;  %v4676_v48 = vcombine.low %v2235_v42, %v2243_v43  ;;  %v2239_v22 = vld [vmem:[%s5719_s22 + $0x30] sm:$0xff]  ;;  %v4700_v42 = vcombine.low %v2255_v34, %v2263_v35  ;;  %s6402_s27 = sld [smem:[#allocation22_spill]] (!%p4843_p6)  ;;  %s6403_s1 = sld [smem:[#allocation23_spill]] (!%p4843_p6) }
 0x5b2   : > { %5282 = vrot.lane.b32.xlu0 %v5281_v47, %s5529_s4  ;;  %v5208_v50 = vpop.f32.mrb[39].mxu0  ;;  %v2244_v47 = vld [vmem:[%s5719_s22 + $0x58] sm:$0xff]  ;;  %v2247_v27 = vld [vmem:[%s5719_s22 + $0x70] sm:$0xff]  ;;  %vm5532_vm9 = vmmov (!%p4843_p6), 0  }
 0x5b3   : > { %2513 = vmatprep.subr.bf16.mxu0 %v4673_v29  ;;  %v4678_v49 = vcombine.low %v2236_v44, %v2244_v47  ;;  %v4679_v50 = vcombine.high %v2236_v44, %v2244_v47  ;;  %v2248_v29 = vld [vmem:[%s5719_s22 + $0x78] sm:$0xff]  ;;  %v4684_v38 = vcombine.low %v2239_v22, %v2247_v27  ;;  %v5294_v44 = vld [vmem:[%s5734_s18 + $0x40] sm:$0xff]  }
 0x5b4   : > { %2514 = vmatpush1.bf16.msra.mxu0 %v4672_v30  ;;  %v5296_v47 = vld [vmem:[%s5734_s18] sm:$0xff]  }
 0x5b5   : > { %2515 = vmatprep.subr.bf16.mxu0 %v4689_v37  ;;  %v2264_v37 = vld [vmem:[%s5719_s22 + $0xf8] sm:$0xff] }
 0x5b6   : > { %v4702_v43 = vcombine.low %v2256_v36, %v2264_v37 }
 0x5b8   : > { %2516 = vmatpush1.bf16.msra.mxu0 %v4688_v39 }
 0x5b9   : > { %2599 = vmatprep.subr.bf16.mxu0 %v4677_v46  ;;  %v5295_v46 = vld [vmem:[%s5734_s18 + $0xc0] sm:$0xff]  }
 0x614   : > { %v5273_v51 = vpop.permute.xlu0 %5272 }
 0x615   : > { %v5275_v53 = vunpack.i.h.bf16 %v5273_v51  ;;  %v5274_v13 = vunpack.i.l.bf16 %v5273_v51 }
 0x617   : > { %v2115_v57 = vsel %vm1198_vm5, %v1761_v31, %v5275_v53  ;;  %v1654_v58 = vsel %vm1198_vm5, %v1300_v14, %v5274_v13  ;;  %v2242_v31 = vld [vmem:[%s5719_s22 + $0x48] sm:$0xff] }
 0x618   : > { %v4674_v32 = vcombine.low %v2234_v28, %v2242_v31  ;;  %v4675_v33 = vcombine.high %v2234_v28, %v2242_v31  ;;  %v2240_v28 = vld [vmem:[%s5719_s22 + $0x38] sm:$0xff] }
 0x619   : > { %v4686_v39 = vcombine.low %v2240_v28, %v2248_v29 }
 0x61a   : > { %2556 = vmatprep.subr.bf16.mxu1 %v4675_v33  ;;  %v4687_v33 = vcombine.high %v2240_v28, %v2248_v29 }
 0x61c   : > { %v5278_v52 = vpop.permute.xlu1 %5277 }
 0x61d   : > { %v5280_v54 = vunpack.i.h.bf16 %v5278_v52  ;;  %v5279_v55 = vunpack.i.l.bf16 %v5278_v52 }
 0x61f   : > { %v2116_v61 = vsel %vm1655_vm7, %v2115_v57, %v5280_v54  ;;  %v1656_v62 = vsel %vm1655_vm7, %v1654_v58, %v5279_v55  ;;  %v4670_v57 = vld [vmem:[%s6398_s19] ss:$0 sm:$0xff] }
 0x624   : > { %v5283_v56 = vpop.permute.xlu0 %5282 }
 0x625   : > { %v5285_v59 = vunpack.i.h.bf16 %v5283_v56  ;;  %v5284_v60 = vunpack.i.l.bf16 %v5283_v56 }
 0x627   : > { %v2117_v63 = vsel %vm1657_vm8, %v2116_v61, %v5285_v59  ;;  %v1658_v0 = vsel %vm1657_vm8, %v1656_v62, %v5284_v60  ;;  %v4671_v62 = vld [vmem:[%s6399_s7] ss:$0 sm:$0xff] }
 0x628   : > { %v2122_v1 = vpack.c.bf16 %v2117_v63, %v1658_v0  ;;  %v2251_v0 = vld [vmem:[%s5719_s22 + $0x90] sm:$0xff] }
 0x62a   : > { %5214 = vmatmul.mubr.msk.bf16.vlgmr.msra.gmra.mrb[36].mxu1 %vm1023_vm4, %v2122_v1  ;;  %v2259_v1 = vld [vmem:[%s5719_s22 + $0xd0] sm:$0xff] }
 0x62b   : > { %2557 = vmatpush1.bf16.msra.mxu1 %v4674_v32  ;;  %2588 = vmatprep.mubr.bf16.mxu1 %v5530_v45  ;;  %v4685_v32 = vcombine.high %v2239_v22, %v2247_v27 }
 0x62c   : > { %2558 = vmatprep.subr.bf16.mxu1 %v4691_v41  ;;  %v4703_v41 = vcombine.high %v2256_v36, %v2264_v37 }
 0x62f   : > { %2559 = vmatpush1.bf16.msra.mxu1 %v4690_v40  ;;  %v4701_v40 = vcombine.high %v2255_v34, %v2263_v35 }
 0x630   : > { %2642 = vmatprep.subr.bf16.mxu1 %v4679_v50  ;;  %v5299_v50 = vld [vmem:[%s5734_s18 + $0xc8] sm:$0xff]  }
 0x6fd   : > { %v2179_v4 = vpop.f32.mrb[36].mxu1 }
 0x6fe   : > { %v2180_v5 = vadd.f32 %v4666_v2, %v2179_v4  ;;  %v5215_v6 = vpop.f32.mrb[37].mxu1  ;;  %v2260_v4 = vld [vmem:[%s5719_s22 + $0xd8] sm:$0xff] }
 0x6ff   : > { %v2182_v7 = vpop.f32.mrb[38].mxu1 }
 0x700   : > { %v2183_v3 = vadd.f32 %v4666_v2, %v2182_v7  ;;  %v5216_v8 = vpop.f32.mrb[39].mxu1  ;;  %v2186_v10 = vadd.f32 %v5462_v9, %v2180_v5  ;;  %v2252_v2 = vld [vmem:[%s5719_s22 + $0x98] sm:$0xff]  ;;  %v2237_v9 = vld [vmem:[%s5719_s22 + $0x20] sm:$0xff] }
 0x701   : > { %v4695_v8 = vcombine.high %v2252_v2, %v2260_v4 }
 0x702   : > { %v2190_v11 = vsel %vm1023_vm4, %v2186_v10, 0.0  ;;  %v2187_v14 = vadd.f32 %v5463_v12, %v2183_v3  ;;  %v4693_v3 = vcombine.high %v2251_v0, %v2259_v1  ;;  %v2246_v12 = vld [vmem:[%s5719_s22 + $0x68] sm:$0xff] }
 0x703   : > { %2191 = vadd.xlane.f32.xlu1 %v2190_v11  ;;  %v2238_v11 = vld [vmem:[%s5719_s22 + $0x28] sm:$0xff] }
 0x704   : > { %v2193_v15 = vsel %vm1023_vm4, %v2187_v14, 0.0 }
 0x705   : > { %2194 = vadd.xlane.f32.xlu0 %v2193_v15  ;;  %v4694_v15 = vcombine.low %v2252_v2, %v2260_v4  ;;  %v5317_v2 = vld [vmem:[%s5734_s18 + $0xa8] sm:$0xff]   ;;  %v5318_v4 = vld [vmem:[%s5734_s18 + $0x70] sm:$0xff]  }
 0x790   : > { %v2192_v16 = vpop.xlane.xlu1 %2191 }
 0x791   : > { %v2197_v17 = vmul.f32 0.03125, %v2192_v16 }
 0x792   : > { %v2195_v18 = vpop.xlane.xlu0 %2194 }
 0x793   : > { %v2199_v19 = vsub.f32 %v2186_v10, %v2197_v17  ;;  %v2198_v20 = vmul.f32 0.03125, %v2195_v18  ;;  %v2245_v10 = vld [vmem:[%s5719_s22 + $0x60] sm:$0xff]  ;;  %v4683_v17 = vcombine.high %v2238_v11, %v2246_v12 }
 0x794   : > { %v4681_v16 = vcombine.high %v2237_v9, %v2245_v10  ;;  %v2253_v18 = vld [vmem:[%s5719_s22 + $0xa0] sm:$0xff] }
 0x795   : > { %v2200_v21 = vsub.f32 %v2187_v14, %v2198_v20  ;;  %v2201_v23 = vmul.f32 %v2199_v19, %v2199_v19  ;;  %v4692_v14 = vcombine.low %v2251_v0, %v2259_v1  ;;  %v2254_v20 = vld [vmem:[%s5719_s22 + $0xa8] sm:$0xff] }
 0x796   : > { %v5315_v0 = vld [vmem:[%s5734_s18 + $0xe8] sm:$0xff]  }
 0x797   : > { %v2203_v24 = vsel %vm1023_vm4, %v2201_v23, 0.0  ;;  %v2202_v25 = vmul.f32 %v2200_v21, %v2200_v21  ;;  %v4680_v23 = vcombine.low %v2237_v9, %v2245_v10  ;;  %v5316_v1 = vld [vmem:[%s5734_s18 + $0x28] sm:$0xff]   ;;  %v5322_v9 = vld [vmem:[%s5734_s18 + $0x78] sm:$0xff]  }
 0x798   : > { %2204 = vadd.xlane.f32.xlu0 %v2203_v24  ;;  %v4682_v24 = vcombine.low %v2238_v11, %v2246_v12  ;;  %v5323_v10 = vld [vmem:[%s5734_s18 + $0xf8] sm:$0xff]  }
 0x799   : > { %v2206_v26 = vsel %vm1023_vm4, %v2202_v25, 0.0  ;;  %v5324_v11 = vld [vmem:[%s5734_s18 + $0x38] sm:$0xff]  }
 0x79a   : > { %2207 = vadd.xlane.f32.xlu1 %v2206_v26  ;;  %v5325_v12 = vld [vmem:[%s5734_s18 + $0xb8] sm:$0xff]  }
 0x825   : > { %v2205_v51 = vpop.xlane.xlu0 %2204 }
 0x826   : > { %v2209_v52 = vmul.f32 0.03125, %v2205_v51  ;;  %v5301_v51 = vld [vmem:[%s5734_s18 + $0x88] sm:$0xff]  }
 0x827   : > { %v2208_v53 = vpop.xlane.xlu1 %2207 }
 0x828   : > { %v2211_v13 = vadd.f32 1e-05, %v2209_v52  ;;  %v2210_v54 = vmul.f32 0.03125, %v2208_v53  ;;  %v5302_v52 = vld [vmem:[%s5734_s18 + $0x50] sm:$0xff]  }
 0x829   : > { %v5303_v53 = vld [vmem:[%s5734_s18 + $0xd0] sm:$0xff]  }
 0x82a   : > { %5454 = vrsqrt.f32 %v2211_v13  ;;  %v2212_v55 = vadd.f32 1e-05, %v2210_v54  ;;  %v5304_v13 = vld [vmem:[%s5734_s18 + $0x10] sm:$0xff]  }
 0x82b   : > { %v5305_v54 = vld [vmem:[%s5734_s18 + $0x90] sm:$0xff]  }
 0x82c   : > { %5456 = vrsqrt.f32 %v2212_v55  ;;  %v5306_v55 = vld [vmem:[%s5734_s18 + $0x58] sm:$0xff]  }
 0x834   : > { %v5455_v56 = vpop.eup %5454 }
 0x835   : > { %v2215_v58 = vmul.f32 %v5455_v56, %v2199_v19  ;;  %v2261_v19 = vld [vmem:[%s5719_s22 + $0xe0] sm:$0xff]  ;;  %v5307_v56 = vld [vmem:[%s5734_s18 + $0xd8] sm:$0xff]  }
 0x836   : > { %v5457_v59 = vpop.eup %5456  ;;  %v4697_v25 = vcombine.high %v2253_v18, %v2261_v19  ;;  %v4696_v31 = vcombine.low %v2253_v18, %v2261_v19  ;;  %v6092_v19 = vld [vmem:[%s5724_s9 + $0x8] sm:$0xff] }
 0x837   : > { %v2223_v60 = vmul.f32 %v4670_v57, %v2215_v58  ;;  %v2216_v61 = vmul.f32 %v5457_v59, %v2200_v21  ;;  %v2262_v21 = vld [vmem:[%s5719_s22 + $0xe8] sm:$0xff]  ;;  %v5309_v58 = vld [vmem:[%s5734_s18 + $0x98] sm:$0xff]   ;;  %v5310_v59 = vld [vmem:[%s5734_s18 + $0x60] sm:$0xff]  }
 0x838   : > { %v4699_v26 = vcombine.high %v2254_v20, %v2262_v21  ;;  %v4698_v30 = vcombine.low %v2254_v20, %v2262_v21 }
 0x839   : > { %v2224_v63 = vmul.f32 %v4670_v57, %v2216_v61  ;;  %v6008_v5 = vadd.f32 %v4671_v62, %v2223_v60  ;;  %v5308_v57 = vld [vmem:[%s5734_s18 + $0x18] sm:$0xff]   ;;  %v5311_v60 = vld [vmem:[%s5734_s18 + $0xe0] sm:$0xff]  }
 0x83a   : > { %v5312_v61 = vld [vmem:[%s5734_s18 + $0x20] sm:$0xff]  }
 0x83b   : > { %v6010_v6 = vadd.f32 %v4671_v62, %v2224_v63  ;;  %v5313_v62 = vld [vmem:[%s5734_s18 + $0xa0] sm:$0xff]   ;;  %v5314_v63 = vld [vmem:[%s5734_s18 + $0x68] sm:$0xff]  }
 0x83d   : > { %v6014_v7 = vpack.c.bf16 %v6010_v6, %v6008_v5 }
 0x83f   : > { %4704 = vmatmul.mubr.msk.bf16.vlgmr.msra.gmra.mrb[40].mxu0 %vm1023_vm4, %v6014_v7  ;;  %4705 = vmatmul.mubr.msk.bf16.vlgmr.msra.gmra.mrb[40].mxu1 %vm1023_vm4, %v6014_v7 }
 0x840   : > { %2600 = vmatpush1.bf16.msra.mxu0 %v4676_v48  ;;  %2643 = vmatpush1.bf16.msra.mxu1 %v4678_v49  ;;  %v5297_v48 = vld [vmem:[%s5734_s18 + $0x80] sm:$0xff]   ;;  %v5298_v49 = vld [vmem:[%s5734_s18 + $0x48] sm:$0xff]  }
 0x841   : > { %2601 = vmatprep.subr.bf16.mxu0 %v4693_v3  ;;  %2644 = vmatprep.subr.bf16.mxu1 %v4695_v8  ;;  %v5320_v3 = vld [vmem:[%s5734_s18 + $0x30] sm:$0xff]  }
 0x842   : > { %2631 = vmatprep.mubr.bf16.mxu0 %v5530_v45  ;;  %2674 = vmatprep.mubr.bf16.mxu1 %v5530_v45  ;;  %v5321_v8 = vld [vmem:[%s5734_s18 + $0xb0] sm:$0xff]  }
 0x844   : > { %2602 = vmatpush1.bf16.msra.mxu0 %v4692_v14  ;;  %2645 = vmatpush1.bf16.msra.mxu1 %v4694_v15  ;;  %v5326_v14 = vld [vmem:[%s5734_s18 + $0x140] sm:$0xff]  }
 0x845   : > { %2685 = vmatprep.subr.bf16.mxu0 %v4681_v16  ;;  %2728 = vmatprep.subr.bf16.mxu1 %v4683_v17  ;;  %v5327_v15 = vld [vmem:[%s5734_s18 + $0x1c0] sm:$0xff]   ;;  %v2270_v16 = vlaneseq }
 0x847   : > { %4706 = vmatmul.mubr.msk.bf16.vlgmr.msra.gmra.mrb[44].mxu0 %vm1023_vm4, %v6014_v7  ;;  %4707 = vmatmul.mubr.msk.bf16.vlgmr.msra.gmra.mrb[44].mxu1 %vm1023_vm4, %v6014_v7  ;;  %v6088_v17 = vshrl.u32 %v2270_v16, 7 }
 0x848   : > { %2686 = vmatpush1.bf16.msra.mxu0 %v4680_v23  ;;  %2729 = vmatpush1.bf16.msra.mxu1 %v4682_v24  ;;  %v2266_v24 = vld [vmem:[%s5724_s9] sm:$0xff] }
 0x849   : > { %2687 = vmatprep.subr.bf16.mxu0 %v4697_v25  ;;  %2730 = vmatprep.subr.bf16.mxu1 %v4699_v26  ;;  %v2296_v18 = vsub.s32 6, %v6088_v17  ;;  %v2272_v21 = vsub.s32 0, %v6088_v17  ;;  %v2280_v23 = vsub.s32 2, %v6088_v17  ;;  %v2276_v25 = vsub.s32 1, %v6088_v17 }
 0x84a   : > { %2717 = vmatprep.mubr.bf16.mxu0 %v5530_v45  ;;  %2760 = vmatprep.mubr.bf16.mxu1 %v5530_v45  ;;  %v2284_v26 = vsub.s32 3, %v6088_v17  ;;  %v2300_v34 = vsub.s32 7, %v6088_v17 }
 0x84b   : > { %v6095_v20 = vrot.slane %v6092_v19, %v2296_v18  ;;  %v2273_v22 = vrot.slane %v2266_v24, %v2272_v21  ;;  %v2281_v27 = vrot.slane %v2266_v24, %v2280_v23  ;;  %v2277_v28 = vrot.slane %v2266_v24, %v2276_v25 }
 0x84c   : > { %2688 = vmatpush1.bf16.msra.mxu0 %v4696_v31  ;;  %2731 = vmatpush1.bf16.msra.mxu1 %v4698_v30  ;;  %v2285_v29 = vrot.slane %v2266_v24, %v2284_v26  ;;  %v2288_v31 = vsub.s32 4, %v6088_v17 }
 0x84d   : > { %2771 = vmatprep.subr.bf16.mxu0 %v4685_v32  ;;  %2814 = vmatprep.subr.bf16.mxu1 %v4687_v33  ;;  %v2292_v33 = vsub.s32 5, %v6088_v17 }
 0x84f   : > { %4708 = vmatmul.mubr.msk.bf16.vlgmr.msra.gmra.mrb[48].mxu0 %vm1023_vm4, %v6014_v7  ;;  %4709 = vmatmul.mubr.msk.bf16.vlgmr.msra.gmra.mrb[48].mxu1 %vm1023_vm4, %v6014_v7 }
 0x850   : > { %2772 = vmatpush1.bf16.msra.mxu0 %v4684_v38  ;;  %2815 = vmatpush1.bf16.msra.mxu1 %v4686_v39 }
 0x851   : > { %2773 = vmatprep.subr.bf16.mxu0 %v4701_v40  ;;  %2816 = vmatprep.subr.bf16.mxu1 %v4703_v41 }
 0x852   : > { %2803 = vmatprep.mubr.bf16.mxu0 %v5530_v45  ;;  %2846 = vmatprep.mubr.bf16.mxu1 %v5530_v45  ;;  %v5300_v45 = vld [vmem:[%s5734_s18 + $0x8] sm:$0xff]  }
 0x854   : > { %2774 = vmatpush1.bf16.msra.mxu0 %v4700_v42  ;;  %2817 = vmatpush1.bf16.msra.mxu1 %v4702_v43 }
 0x855   : > { %4904 = vmatprep.subr.bf16.mxu0 %v5294_v44  ;;  %4926 = vmatprep.subr.bf16.mxu1 %v5295_v46 }
 0x857   : > { %4710 = vmatmul.mubr.msk.bf16.vlgmr.msra.gmra.mrb[52].mxu0 %vm1023_vm4, %v6014_v7  ;;  %4711 = vmatmul.mubr.msk.bf16.vlgmr.msra.gmra.mrb[52].mxu1 %vm1023_vm4, %v6014_v7  ;;  %v5319_v7 = vld [vmem:[%s5734_s18 + $0xf0] sm:$0xff]  }
 0x858   : > { %4905 = vmatpush3.bf16.msra.mxu0 %v5296_v47  ;;  %4927 = vmatpush3.bf16.msra.mxu1 %v5297_v48  ;;  %v2289_v48 = vrot.slane %v2266_v24, %v2288_v31 }
 0x859   : > { %4906 = vmatprep.subr.bf16.mxu0 %v5298_v49  ;;  %4928 = vmatprep.subr.bf16.mxu1 %v5299_v50  ;;  %v2297_v49 = vrot.slane %v2266_v24, %v2296_v18 }
 0x85c   : > { %4907 = vmatpush3.bf16.msra.mxu0 %v5300_v45  ;;  %4929 = vmatpush3.bf16.msra.mxu1 %v5301_v51  ;;  %v2293_v51 = vrot.slane %v2266_v24, %v2292_v33 }
 0x85d   : > { %4908 = vmatprep.subr.bf16.mxu0 %v5302_v52  ;;  %4930 = vmatprep.subr.bf16.mxu1 %v5303_v53  ;;  %v2301_v52 = vrot.slane %v2266_v24, %v2300_v34  ;;  %v2313_v24 = vrot.slane %v6092_v19, %v2280_v23  ;;  %v2317_v23 = vrot.slane %v6092_v19, %v2284_v26 }
 0x860   : > { %4909 = vmatpush3.bf16.msra.mxu0 %v5304_v13  ;;  %4931 = vmatpush3.bf16.msra.mxu1 %v5305_v54 }
 0x861   : > { %4910 = vmatprep.subr.bf16.mxu0 %v5306_v55  ;;  %4932 = vmatprep.subr.bf16.mxu1 %v5307_v56 }
 0x864   : > { %4911 = vmatpush3.bf16.msra.mxu0 %v5308_v57  ;;  %4933 = vmatpush3.bf16.msra.mxu1 %v5309_v58 }
 0x865   : > { %4912 = vmatprep.subr.bf16.mxu0 %v5310_v59  ;;  %4934 = vmatprep.subr.bf16.mxu1 %v5311_v60 }
 0x868   : > { %4913 = vmatpush3.bf16.msra.mxu0 %v5312_v61  ;;  %4935 = vmatpush3.bf16.msra.mxu1 %v5313_v62 }
 0x869   : > { %4914 = vmatprep.subr.bf16.mxu0 %v5314_v63  ;;  %4936 = vmatprep.subr.bf16.mxu1 %v5315_v0 }
 0x86c   : > { %4915 = vmatpush3.bf16.msra.mxu0 %v5316_v1  ;;  %4937 = vmatpush3.bf16.msra.mxu1 %v5317_v2  ;;  %v5328_v2 = vld [vmem:[%s5734_s18 + $0x100] sm:$0xff]  }
 0x86d   : > { %4916 = vmatprep.subr.bf16.mxu0 %v5318_v4  ;;  %4938 = vmatprep.subr.bf16.mxu1 %v5319_v7  ;;  %v5329_v4 = vld [vmem:[%s5734_s18 + $0x180] sm:$0xff]  }
 0x870   : > { %4917 = vmatpush3.bf16.msra.mxu0 %v5320_v3  ;;  %4939 = vmatpush3.bf16.msra.mxu1 %v5321_v8 }
 0x871   : > { %4918 = vmatprep.subr.bf16.mxu0 %v5322_v9  ;;  %4940 = vmatprep.subr.bf16.mxu1 %v5323_v10  ;;  %v5330_v10 = vld [vmem:[%s5734_s18 + $0x148] sm:$0xff]  }
 0x874   : > { %4919 = vmatpush3.bf16.msra.mxu0 %v5324_v11  ;;  %4941 = vmatpush3.bf16.msra.mxu1 %v5325_v12  ;;  %v5331_v11 = vld [vmem:[%s5734_s18 + $0x1c8] sm:$0xff]   ;;  %v2305_v12 = vrot.slane %v6092_v19, %v2272_v21  ;;  %v2309_v21 = vrot.slane %v6092_v19, %v2276_v25  ;;  %v5335_v25 = vld [vmem:[%s5734_s18 + $0x1d0] sm:$0xff]  }
 0x875   : > { %4948 = vmatprep.subr.bf16.mxu0 %v5326_v14  ;;  %4970 = vmatprep.subr.bf16.mxu1 %v5327_v15 }
 0x912   : > { %v2547_v30 = vpop.f32.mrb[40].mxu0  ;;  %v2590_v32 = vpop.f32.mrb[40].mxu1 }
 0x913   : > { %v2548_v35 = vadd.f32 %v2547_v30, %v2273_v22  ;;  %v2591_v36 = vadd.f32 %v2590_v32, %v2281_v27  ;;  %v2549_v37 = vpop.f32.mrb[41].mxu0  ;;  %v2592_v38 = vpop.f32.mrb[41].mxu1 }
 0x914   : > { %v2550_v39 = vadd.f32 %v2549_v37, %v2277_v28  ;;  %v2593_v40 = vadd.f32 %v2592_v38, %v2285_v29  ;;  %v2551_v41 = vpop.f32.mrb[42].mxu0  ;;  %v2594_v42 = vpop.f32.mrb[42].mxu1 }
 0x915   : > { %v2552_v43 = vadd.f32 %v2551_v41, %v2273_v22  ;;  %v2595_v44 = vadd.f32 %v2594_v42, %v2281_v27  ;;  %v2553_v46 = vpop.f32.mrb[43].mxu0  ;;  %v2596_v47 = vpop.f32.mrb[43].mxu1  ;;  %v2857_v53 = vmax.f32 %v2548_v35, 0.0  ;;  %v2859_v13 = vmax.f32 %v2591_v36, 0.0  ;;  %v5332_v35 = vld [vmem:[%s5734_s18 + $0x108] sm:$0xff]   ;;  %v5334_v41 = vld [vmem:[%s5734_s18 + $0x150] sm:$0xff]  }
 0x916   : > { %v2554_v50 = vadd.f32 %v2553_v46, %v2277_v28  ;;  %v2597_v45 = vadd.f32 %v2596_v47, %v2285_v29  ;;  %v2858_v56 = vmax.f32 %v2550_v39, 0.0  ;;  %v2860_v57 = vmax.f32 %v2593_v40, 0.0  ;;  %v5333_v36 = vld [vmem:[%s5734_s18 + $0x188] sm:$0xff]  }
 0x917   : > { %v2873_v54 = vmax.f32 %v2552_v43, 0.0  ;;  %v2875_v55 = vmax.f32 %v2595_v44, 0.0 }
 0x918   : > { %v2874_v58 = vmax.f32 %v2554_v50, 0.0  ;;  %v2876_v59 = vmax.f32 %v2597_v45, 0.0 }
 0x919   : > { %v2889_v60 = vpack.c.bf16 %v2873_v54, %v2857_v53  ;;  %v2891_v61 = vpack.c.bf16 %v2875_v55, %v2859_v13 }
 0x91a   : > { %v2890_v62 = vpack.c.bf16 %v2874_v58, %v2858_v56  ;;  %v2892_v63 = vpack.c.bf16 %v2876_v59, %v2860_v57  ;;  %v2633_v0 = vpop.f32.mrb[44].mxu0  ;;  %v2676_v1 = vpop.f32.mrb[44].mxu1  ;;  %v5338_v56 = vld [vmem:[%s5734_s18 + $0x158] sm:$0xff]  }
 0x91b   : > { %v2634_v7 = vadd.f32 %v2633_v0, %v2289_v48  ;;  %v2677_v3 = vadd.f32 %v2676_v1, %v2297_v49  ;;  %v2635_v8 = vpop.f32.mrb[45].mxu0  ;;  %v2678_v9 = vpop.f32.mrb[45].mxu1  ;;  %v5339_v57 = vld [vmem:[%s5734_s18 + $0x1d8] sm:$0xff]  }
 0x91c   : > { %v2636_v14 = vadd.f32 %v2635_v8, %v2293_v51  ;;  %v2679_v15 = vadd.f32 %v2678_v9, %v2301_v52  ;;  %v2637_v16 = vpop.f32.mrb[46].mxu0  ;;  %v2680_v18 = vpop.f32.mrb[46].mxu1  ;;  %3968 = vmatprep.mubr.bf16.mxu0 %v2890_v62  ;;  %4009 = vmatprep.mubr.bf16.mxu1 %v2892_v63  ;;  %v5340_v8 = vld [vmem:[%s5734_s18 + $0x118] sm:$0xff]  }
 0x91d   : > { %v2638_v22 = vadd.f32 %v2637_v16, %v2289_v48  ;;  %v2681_v27 = vadd.f32 %v2680_v18, %v2297_v49  ;;  %v2639_v28 = vpop.f32.mrb[47].mxu0  ;;  %v2682_v29 = vpop.f32.mrb[47].mxu1  ;;  %3969 = vmatmul.mubr.bf16.vlgmr.msra.gmra.mrb[56].mxu0 %v2889_v60  ;;  %4010 = vmatmul.mubr.bf16.vlgmr.msra.gmra.mrb[56].mxu1 %v2891_v61  ;;  %v2861_v37 = vmax.f32 %v2634_v7, 0.0  ;;  %v2863_v38 = vmax.f32 %v2677_v3, 0.0  ;;  %v5341_v9 = vld [vmem:[%s5734_s18 + $0x198] sm:$0xff]  }
 0x91e   : > { %v2640_v30 = vadd.f32 %v2639_v28, %v2293_v51  ;;  %v2683_v32 = vadd.f32 %v2682_v29, %v2301_v52  ;;  %4949 = vmatpush3.bf16.msra.mxu0 %v5328_v2  ;;  %4971 = vmatpush3.bf16.msra.mxu1 %v5329_v4  ;;  %v2862_v42 = vmax.f32 %v2636_v14, 0.0  ;;  %v2864_v43 = vmax.f32 %v2679_v15, 0.0  ;;  %v5336_v51 = vld [vmem:[%s5734_s18 + $0x110] sm:$0xff]  }
 0x91f   : > { %v2877_v39 = vmax.f32 %v2638_v22, 0.0  ;;  %v2879_v40 = vmax.f32 %v2681_v27, 0.0  ;;  %4950 = vmatprep.subr.bf16.mxu0 %v5330_v10  ;;  %4972 = vmatprep.subr.bf16.mxu1 %v5331_v11  ;;  %v5337_v52 = vld [vmem:[%s5734_s18 + $0x190] sm:$0xff]   ;;  %v2321_v2 = vrot.slane %v6092_v19, %v2288_v31  ;;  %v2325_v4 = vrot.slane %v6092_v19, %v2292_v33  ;;  %v5342_v31 = vld [vmem:[%s5734_s18 + $0x160] sm:$0xff]  }
 0x920   : > { %v2878_v44 = vmax.f32 %v2640_v30, 0.0  ;;  %v2880_v46 = vmax.f32 %v2683_v32, 0.0  ;;  %v2333_v10 = vrot.slane %v6092_v19, %v2300_v34  ;;  %v5343_v33 = vld [vmem:[%s5734_s18 + $0x1e0] sm:$0xff]  }
 0x921   : > { %v6131_v47 = vpack.c.bf16 %v2877_v39, %v2861_v37  ;;  %v6133_v48 = vpack.c.bf16 %v2879_v40, %v2863_v38  ;;  %v5345_v30 = vld [vmem:[%s5734_s18 + $0x1a0] sm:$0xff]   ;;  %v5346_v37 = vld [vmem:[%s5734_s18 + $0x168] sm:$0xff]  }
 0x922   : > { %v2894_v26 = vpack.c.bf16 %v2878_v44, %v2862_v42  ;;  %v2896_v49 = vpack.c.bf16 %v2880_v46, %v2864_v43  ;;  %4951 = vmatpush3.bf16.msra.mxu0 %v5332_v35  ;;  %4973 = vmatpush3.bf16.msra.mxu1 %v5333_v36  ;;  %v2719_v50 = vpop.f32.mrb[48].mxu0  ;;  %v2762_v45 = vpop.f32.mrb[48].mxu1  ;;  %v5347_v38 = vld [vmem:[%s5734_s18 + $0x1e8] sm:$0xff]  }
 0x923   : > { %v2720_v53 = vadd.f32 %v2719_v50, %v2305_v12  ;;  %v2763_v13 = vadd.f32 %v2762_v45, %v2313_v24  ;;  %v2721_v54 = vpop.f32.mrb[49].mxu0  ;;  %v2764_v55 = vpop.f32.mrb[49].mxu1  ;;  %4952 = vmatprep.subr.bf16.mxu0 %v5334_v41  ;;  %4974 = vmatprep.subr.bf16.mxu1 %v5335_v25  ;;  %v5348_v50 = vld [vmem:[%s5734_s18 + $0x128] sm:$0xff]  }
 0x924   : > { %v2722_v58 = vadd.f32 %v2721_v54, %v2309_v21  ;;  %v2765_v59 = vadd.f32 %v2764_v55, %v2317_v23  ;;  %v2723_v60 = vpop.f32.mrb[50].mxu0  ;;  %v2766_v61 = vpop.f32.mrb[50].mxu1  ;;  %4050 = vmatprep.mubr.bf16.mxu0 %v2894_v26  ;;  %4091 = vmatprep.mubr.bf16.mxu1 %v2896_v49  ;;  %v5349_v45 = vld [vmem:[%s5734_s18 + $0x1a8] sm:$0xff]   ;;  %v5350_v54 = vld [vmem:[%s5734_s18 + $0x170] sm:$0xff]  }
 0x925   : > { %v2724_v62 = vadd.f32 %v2723_v60, %v2305_v12  ;;  %v2767_v63 = vadd.f32 %v2766_v61, %v2313_v24  ;;  %v2725_v0 = vpop.f32.mrb[51].mxu0  ;;  %v2768_v1 = vpop.f32.mrb[51].mxu1  ;;  %v2865_v11 = vmax.f32 %v2720_v53, 0.0  ;;  %v2867_v12 = vmax.f32 %v2763_v13, 0.0 }
 0x926   : > { %v2726_v7 = vadd.f32 %v2725_v0, %v2309_v21  ;;  %v2769_v3 = vadd.f32 %v2768_v1, %v2317_v23  ;;  %4953 = vmatpush3.bf16.msra.mxu0 %v5336_v51  ;;  %4975 = vmatpush3.bf16.msra.mxu1 %v5337_v52  ;;  %v2866_v16 = vmax.f32 %v2722_v58, 0.0  ;;  %v2868_v18 = vmax.f32 %v2765_v59, 0.0  ;;  %v5344_v21 = vld [vmem:[%s5734_s18 + $0x120] sm:$0xff]   ;;  %v5353_v0 = vld [vmem:[%s5734_s18 + $0x1b0] sm:$0xff]   ;;  %v5354_v1 = vld [vmem:[%s5734_s18 + $0x178] sm:$0xff]  }
 0x927   : > { %v2881_v14 = vmax.f32 %v2724_v62, 0.0  ;;  %v2883_v15 = vmax.f32 %v2767_v63, 0.0  ;;  %4954 = vmatprep.subr.bf16.mxu0 %v5338_v56  ;;  %4976 = vmatprep.subr.bf16.mxu1 %v5339_v57  ;;  %v5352_v63 = vld [vmem:[%s5734_s18 + $0x130] sm:$0xff]  }
 0x928   : > { %v2882_v24 = vmax.f32 %v2726_v7, 0.0  ;;  %v2884_v22 = vmax.f32 %v2769_v3, 0.0  ;;  %v5357_v7 = vld [vmem:[%s5734_s18 + $0x1b8] sm:$0xff]   ;;  %v5358_v3 = vld [vmem:[%s5734_s18 + $0x240] sm:$0xff]  }
 0x929   : > { %v6152_v27 = vpack.c.bf16 %v2881_v14, %v2865_v11  ;;  %v6154_v17 = vpack.c.bf16 %v2883_v15, %v2867_v12  ;;  %v5362_v11 = vld [vmem:[%s5734_s18 + $0x248] sm:$0xff]  }
 0x92a   : > { %v6156_v19 = vpack.c.bf16 %v2882_v24, %v2866_v16  ;;  %v6158_v34 = vpack.c.bf16 %v2884_v22, %v2868_v18  ;;  %4955 = vmatpush3.bf16.msra.mxu0 %v5340_v8  ;;  %4977 = vmatpush3.bf16.msra.mxu1 %v5341_v9  ;;  %v2805_v28 = vpop.f32.mrb[52].mxu0  ;;  %v2848_v29 = vpop.f32.mrb[52].mxu1  ;;  %v5359_v8 = vld [vmem:[%s5734_s18 + $0x2c0] sm:$0xff]   ;;  %v5363_v12 = vld [vmem:[%s5734_s18 + $0x2c8] sm:$0xff]   ;;  %v5370_v16 = vld [vmem:[%s5734_s18 + $0x258] sm:$0xff]  }
 0x92b   : > { %v2806_v32 = vadd.f32 %v2805_v28, %v2321_v2  ;;  %v2849_v35 = vadd.f32 %v2848_v29, %v6095_v20  ;;  %v2807_v36 = vpop.f32.mrb[53].mxu0  ;;  %v2850_v23 = vpop.f32.mrb[53].mxu1  ;;  %4956 = vmatprep.subr.bf16.mxu0 %v5342_v31  ;;  %4978 = vmatprep.subr.bf16.mxu1 %v5343_v33  ;;  %v5360_v9 = vld [vmem:[%s5734_s18 + $0x200] sm:$0xff]   ;;  %v5364_v14 = vld [vmem:[%s5734_s18 + $0x208] sm:$0xff]   ;;  %v5366_v31 = vld [vmem:[%s5734_s18 + $0x250] sm:$0xff]  }
 0x92c   : > { %v2808_v39 = vadd.f32 %v2807_v36, %v2325_v4  ;;  %v2851_v40 = vadd.f32 %v2850_v23, %v2333_v10  ;;  %v2809_v41 = vpop.f32.mrb[54].mxu0  ;;  %v2852_v25 = vpop.f32.mrb[54].mxu1  ;;  %v5365_v15 = vld [vmem:[%s5734_s18 + $0x288] sm:$0xff]   ;;  %v5369_v33 = vld [vmem:[%s5734_s18 + $0x290] sm:$0xff]   ;;  %v5371_v18 = vld [vmem:[%s5734_s18 + $0x2d8] sm:$0xff]  }
 0x92d   : > { %v2810_v42 = vadd.f32 %v2809_v41, %v2321_v2  ;;  %v2853_v43 = vadd.f32 %v2852_v25, %v6095_v20  ;;  %v2811_v44 = vpop.f32.mrb[55].mxu0  ;;  %v2854_v46 = vpop.f32.mrb[55].mxu1  ;;  %v2869_v51 = vmax.f32 %v2806_v32, 0.0  ;;  %v2871_v52 = vmax.f32 %v2849_v35, 0.0  ;;  %v5351_v20 = vld [vmem:[%s5734_s18 + $0x1f0] sm:$0xff]   ;;  %v5355_v2 = vld [vmem:[%s5734_s18 + $0x1f8] sm:$0xff]  }
 0x92e   : > { %v2812_v26 = vadd.f32 %v2811_v44, %v2325_v4  ;;  %v2855_v49 = vadd.f32 %v2854_v46, %v2333_v10  ;;  %4957 = vmatpush3.bf16.msra.mxu0 %v5344_v21  ;;  %4979 = vmatpush3.bf16.msra.mxu1 %v5345_v30  ;;  %v2870_v55 = vmax.f32 %v2808_v39, 0.0  ;;  %v2872_v56 = vmax.f32 %v2851_v40, 0.0  ;;  %v5356_v4 = vld [vmem:[%s5734_s18 + $0x138] sm:$0xff]   ;;  %v5361_v10 = vld [vmem:[%s5734_s18 + $0x280] sm:$0xff]   ;;  %v5378_v21 = vld [vmem:[%s5734_s18 + $0x268] sm:$0xff]  }
 0x92f   : > { %v2885_v53 = vmax.f32 %v2810_v42, 0.0  ;;  %v2887_v13 = vmax.f32 %v2853_v43, 0.0  ;;  %4958 = vmatprep.subr.bf16.mxu0 %v5346_v37  ;;  %4980 = vmatprep.subr.bf16.mxu1 %v5347_v38  ;;  %v5372_v24 = vld [vmem:[%s5734_s18 + $0x218] sm:$0xff]   ;;  %v5376_v28 = vld [vmem:[%s5734_s18 + $0x220] sm:$0xff]   ;;  %v5379_v30 = vld [vmem:[%s5734_s18 + $0x2e8] sm:$0xff]  }
 0x930   : > { %v2886_v57 = vmax.f32 %v2812_v26, 0.0  ;;  %v2888_v58 = vmax.f32 %v2855_v49, 0.0  ;;  %v5373_v22 = vld [vmem:[%s5734_s18 + $0x298] sm:$0xff]   ;;  %v5377_v29 = vld [vmem:[%s5734_s18 + $0x2a0] sm:$0xff]   ;;  %v5380_v32 = vld [vmem:[%s5734_s18 + $0x228] sm:$0xff]  }
 0x931   : > { %v6170_v59 = vpack.c.bf16 %v2885_v53, %v2869_v51  ;;  %v6172_v60 = vpack.c.bf16 %v2887_v13, %v2871_v52  ;;  %v5381_v35 = vld [vmem:[%s5734_s18 + $0x2a8] sm:$0xff]   ;;  %v5382_v36 = vld [vmem:[%s5734_s18 + $0x270] sm:$0xff]   ;;  %v5386_v39 = vld [vmem:[%s5734_s18 + $0x278] sm:$0xff]  }
 0x932   : > { %v6174_v61 = vpack.c.bf16 %v2886_v57, %v2870_v55  ;;  %v6176_v62 = vpack.c.bf16 %v2888_v58, %v2872_v56  ;;  %4959 = vmatpush3.bf16.msra.mxu0 %v5348_v50  ;;  %4981 = vmatpush3.bf16.msra.mxu1 %v5349_v45  ;;  %v5383_v23 = vld [vmem:[%s5734_s18 + $0x2f0] sm:$0xff]   ;;  %v5387_v40 = vld [vmem:[%s5734_s18 + $0x2f8] sm:$0xff]   ;;  %v5390_v42 = vld [vmem:[%s5734_s18 + $0x340] sm:$0xff]  }
 0x933   : > { %4960 = vmatprep.subr.bf16.mxu0 %v5350_v54  ;;  %4982 = vmatprep.subr.bf16.mxu1 %v5351_v20  ;;  %v5384_v37 = vld [vmem:[%s5734_s18 + $0x230] sm:$0xff]   ;;  %v5388_v41 = vld [vmem:[%s5734_s18 + $0x238] sm:$0xff]   ;;  %v5391_v43 = vld [vmem:[%s5734_s18 + $0x3c0] sm:$0xff]  }
 0x934   : > { %v5385_v38 = vld [vmem:[%s5734_s18 + $0x2b0] sm:$0xff]   ;;  %v5389_v25 = vld [vmem:[%s5734_s18 + $0x2b8] sm:$0xff]   ;;  %v5392_v44 = vld [vmem:[%s5734_s18 + $0x300] sm:$0xff]  }
 0x935   : > { %v5393_v46 = vld [vmem:[%s5734_s18 + $0x380] sm:$0xff]   ;;  %v5394_v26 = vld [vmem:[%s5734_s18 + $0x348] sm:$0xff]   ;;  %v5398_v51 = vld [vmem:[%s5734_s18 + $0x350] sm:$0xff]  }
 0x936   : > { %4961 = vmatpush3.bf16.msra.mxu0 %v5352_v63  ;;  %4983 = vmatpush3.bf16.msra.mxu1 %v5353_v0  ;;  %v5395_v49 = vld [vmem:[%s5734_s18 + $0x3c8] sm:$0xff]   ;;  %v5401_v52 = vld [vmem:[%s5734_s18 + $0x390] sm:$0xff]   ;;  %v5402_v53 = vld [vmem:[%s5734_s18 + $0x358] sm:$0xff]  }
 0x937   : > { %4962 = vmatprep.subr.bf16.mxu0 %v5354_v1  ;;  %4984 = vmatprep.subr.bf16.mxu1 %v5355_v2  ;;  %v5396_v50 = vld [vmem:[%s5734_s18 + $0x308] sm:$0xff]   ;;  %v5403_v13 = vld [vmem:[%s5734_s18 + $0x3d8] sm:$0xff]   ;;  %v5406_v55 = vld [vmem:[%s5734_s18 + $0x360] sm:$0xff]  }
 0x938   : > { %v5397_v45 = vld [vmem:[%s5734_s18 + $0x388] sm:$0xff]   ;;  %v5404_v54 = vld [vmem:[%s5734_s18 + $0x318] sm:$0xff]   ;;  %v5407_v56 = vld [vmem:[%s5734_s18 + $0x3e0] sm:$0xff]  }
 0x939   : > { %v5405_v20 = vld [vmem:[%s5734_s18 + $0x398] sm:$0xff]   ;;  %v5408_v57 = vld [vmem:[%s5734_s18 + $0x320] sm:$0xff]   ;;  %v5412_v63 = vld [vmem:[%s5734_s18 + $0x328] sm:$0xff]  }
 0x93a   : > { %4963 = vmatpush3.bf16.msra.mxu0 %v5356_v4  ;;  %4985 = vmatpush3.bf16.msra.mxu1 %v5357_v7  ;;  %v5409_v58 = vld [vmem:[%s5734_s18 + $0x3a0] sm:$0xff]   ;;  %v5413_v0 = vld [vmem:[%s5734_s18 + $0x3a8] sm:$0xff]   ;;  %v5414_v1 = vld [vmem:[%s5734_s18 + $0x370] sm:$0xff]  }
 0x93b   : > { %4992 = vmatprep.subr.bf16.mxu0 %v5358_v3  ;;  %5014 = vmatprep.subr.bf16.mxu1 %v5359_v8  ;;  %v5415_v2 = vld [vmem:[%s5734_s18 + $0x3f0] sm:$0xff]   ;;  %v5418_v3 = vld [vmem:[%s5734_s18 + $0x378] sm:$0xff]  }
 0x93c   : > { %v5416_v4 = vld [vmem:[%s5734_s18 + $0x330] sm:$0xff]   ;;  %v5419_v8 = vld [vmem:[%s5734_s18 + $0x3f8] sm:$0xff]  }
 0x93d   : > { %4051 = vmatmul.mubr.bf16.vlgmr.msra.gmra.mrb[60].mxu0 %v6131_v47  ;;  %4092 = vmatmul.mubr.bf16.vlgmr.msra.gmra.mrb[60].mxu1 %v6133_v48  ;;  %v5367_v47 = vld [vmem:[%s5734_s18 + $0x2d0] sm:$0xff]  }
 0x93e   : > { %4993 = vmatpush3.bf16.msra.mxu0 %v5360_v9  ;;  %4132 = vmatprep.mubr.bf16.mxu0 %v6156_v19  ;;  %v5368_v48 = vld [vmem:[%s5734_s18 + $0x210] sm:$0xff]   ;;  %v5374_v19 = vld [vmem:[%s5734_s18 + $0x260] sm:$0xff]   ;;  %v5420_v9 = vld [vmem:[%s5734_s18 + $0x338] sm:$0xff]  }
 0x93f   : > { %5015 = vmatpush3.bf16.msra.mxu1 %v5361_v10  ;;  %4173 = vmatprep.mubr.bf16.mxu1 %v6158_v34  ;;  %v5375_v34 = vld [vmem:[%s5734_s18 + $0x2e0] sm:$0xff]   ;;  %v5417_v7 = vld [vmem:[%s5734_s18 + $0x3b0] sm:$0xff]   ;;  %v5421_v10 = vld [vmem:[%s5734_s18 + $0x3b8] sm:$0xff]  }
 0x940   : > { %4994 = vmatprep.subr.bf16.mxu0 %v5362_v11  ;;  %5016 = vmatprep.subr.bf16.mxu1 %v5363_v12 }
 0x942   : > { %4995 = vmatpush3.bf16.msra.mxu0 %v5364_v14  ;;  %v4712_v14 = vld [vmem:[%s918_s20] ss:$0 sm:$0xff] }
 0x943   : > { %5017 = vmatpush3.bf16.msra.mxu1 %v5365_v15  ;;  %4996 = vmatprep.subr.bf16.mxu0 %v5366_v31 }
 0x944   : > { %5018 = vmatprep.subr.bf16.mxu1 %v5367_v47 }
 0x946   : > { %4997 = vmatpush3.bf16.msra.mxu0 %v5368_v48 }
 0x947   : > { %5019 = vmatpush3.bf16.msra.mxu1 %v5369_v33  ;;  %4998 = vmatprep.subr.bf16.mxu0 %v5370_v16 }
 0x948   : > { %5020 = vmatprep.subr.bf16.mxu1 %v5371_v18 }
 0x94a   : > { %4999 = vmatpush3.bf16.msra.mxu0 %v5372_v24 }
 0x94b   : > { %5021 = vmatpush3.bf16.msra.mxu1 %v5373_v22  ;;  %5000 = vmatprep.subr.bf16.mxu0 %v5374_v19 }
 0x94c   : > { %5022 = vmatprep.subr.bf16.mxu1 %v5375_v34 }
 0x94e   : > { %5001 = vmatpush3.bf16.msra.mxu0 %v5376_v28 }
 0x94f   : > { %5023 = vmatpush3.bf16.msra.mxu1 %v5377_v29  ;;  %5002 = vmatprep.subr.bf16.mxu0 %v5378_v21 }
 0x950   : > { %5024 = vmatprep.subr.bf16.mxu1 %v5379_v30 }
 0x952   : > { %5003 = vmatpush3.bf16.msra.mxu0 %v5380_v32 }
 0x953   : > { %5025 = vmatpush3.bf16.msra.mxu1 %v5381_v35  ;;  %5004 = vmatprep.subr.bf16.mxu0 %v5382_v36 }
 0x954   : > { %5026 = vmatprep.subr.bf16.mxu1 %v5383_v23 }
 0x956   : > { %5005 = vmatpush3.bf16.msra.mxu0 %v5384_v37 }
 0x957   : > { %5027 = vmatpush3.bf16.msra.mxu1 %v5385_v38  ;;  %5006 = vmatprep.subr.bf16.mxu0 %v5386_v39 }
 0x958   : > { %5028 = vmatprep.subr.bf16.mxu1 %v5387_v40 }
 0x95a   : > { %5007 = vmatpush3.bf16.msra.mxu0 %v5388_v41 }
 0x95b   : > { %5029 = vmatpush3.bf16.msra.mxu1 %v5389_v25  ;;  %5036 = vmatprep.subr.bf16.mxu0 %v5390_v42 }
 0x95c   : > { %5058 = vmatprep.subr.bf16.mxu1 %v5391_v43 }
 0x95d   : > { %4133 = vmatmul.mubr.bf16.vlgmr.msra.gmra.mrb[64].mxu0 %v6152_v27  ;;  %v5399_v27 = vld [vmem:[%s5734_s18 + $0x3d0] sm:$0xff]  }
 0x95e   : > { %4174 = vmatmul.mubr.bf16.vlgmr.msra.gmra.mrb[64].mxu1 %v6154_v17  ;;  %5037 = vmatpush3.bf16.msra.mxu0 %v5392_v44  ;;  %v5400_v17 = vld [vmem:[%s5734_s18 + $0x310] sm:$0xff]  }
 0x95f   : > { %4214 = vmatprep.mubr.bf16.mxu0 %v6174_v61  ;;  %5059 = vmatpush3.bf16.msra.mxu1 %v5393_v46  ;;  %v5410_v61 = vld [vmem:[%s5734_s18 + $0x368] sm:$0xff]  }
 0x960   : > { %4255 = vmatprep.mubr.bf16.mxu1 %v6176_v62  ;;  %5038 = vmatprep.subr.bf16.mxu0 %v5394_v26  ;;  %v5411_v62 = vld [vmem:[%s5734_s18 + $0x3e8] sm:$0xff]  }
 0x961   : > { %5060 = vmatprep.subr.bf16.mxu1 %v5395_v49 }
 0x962   : > { %5039 = vmatpush3.bf16.msra.mxu0 %v5396_v50 }
 0x963   : > { %5061 = vmatpush3.bf16.msra.mxu1 %v5397_v45  ;;  %5040 = vmatprep.subr.bf16.mxu0 %v5398_v51 }
 0x964   : > { %5062 = vmatprep.subr.bf16.mxu1 %v5399_v27 }
 0x966   : > { %5041 = vmatpush3.bf16.msra.mxu0 %v5400_v17 }
 0x967   : > { %5063 = vmatpush3.bf16.msra.mxu1 %v5401_v52  ;;  %5042 = vmatprep.subr.bf16.mxu0 %v5402_v53 }
 0x968   : > { %5064 = vmatprep.subr.bf16.mxu1 %v5403_v13 }
 0x96a   : > { %5043 = vmatpush3.bf16.msra.mxu0 %v5404_v54 }
 0x96b   : > { %5065 = vmatpush3.bf16.msra.mxu1 %v5405_v20  ;;  %5044 = vmatprep.subr.bf16.mxu0 %v5406_v55 }
 0x96c   : > { %5066 = vmatprep.subr.bf16.mxu1 %v5407_v56 }
 0x96e   : > { %5045 = vmatpush3.bf16.msra.mxu0 %v5408_v57 }
 0x96f   : > { %5067 = vmatpush3.bf16.msra.mxu1 %v5409_v58  ;;  %5046 = vmatprep.subr.bf16.mxu0 %v5410_v61 }
 0x970   : > { %5068 = vmatprep.subr.bf16.mxu1 %v5411_v62 }
 0x972   : > { %5047 = vmatpush3.bf16.msra.mxu0 %v5412_v63 }
 0x973   : > { %5069 = vmatpush3.bf16.msra.mxu1 %v5413_v0  ;;  %5048 = vmatprep.subr.bf16.mxu0 %v5414_v1 }
 0x974   : > { %5070 = vmatprep.subr.bf16.mxu1 %v5415_v2 }
 0x976   : > { %5049 = vmatpush3.bf16.msra.mxu0 %v5416_v4 }
 0x977   : > { %5071 = vmatpush3.bf16.msra.mxu1 %v5417_v7  ;;  %5050 = vmatprep.subr.bf16.mxu0 %v5418_v3 }
 0x978   : > { %5072 = vmatprep.subr.bf16.mxu1 %v5419_v8 }
 0x97a   : > { %5051 = vmatpush3.bf16.msra.mxu0 %v5420_v9 }
 0x97b   : > { %5073 = vmatpush3.bf16.msra.mxu1 %v5421_v10 }
 0x97d   : > { %4215 = vmatmul.mubr.bf16.vlgmr.msra.gmra.mrb[68].mxu0 %v6170_v59 }
 0x97e   : > { %4256 = vmatmul.mubr.bf16.vlgmr.msra.gmra.mrb[68].mxu1 %v6172_v60 }
 0x9f0   : > { %v4920_v11 = vpop.f32.mrb[56].mxu0  ;;  %v4942_v12 = vpop.f32.mrb[56].mxu1 }
 0x9f1   : > { %v4921_v15 = vpop.f32.mrb[57].mxu0  ;;  %v4943_v31 = vpop.f32.mrb[57].mxu1 }
 0x9f2   : > { %v4922_v47 = vadd.f32 %v4921_v15, %v4920_v11  ;;  %v4944_v48 = vadd.f32 %v4943_v31, %v4942_v12  ;;  %v4923_v33 = vpop.f32.mrb[58].mxu0  ;;  %v4945_v16 = vpop.f32.mrb[58].mxu1 }
 0x9f3   : > { %v4924_v18 = vpop.f32.mrb[59].mxu0  ;;  %v4946_v24 = vpop.f32.mrb[59].mxu1 }
 0x9f4   : > { %v3971_v22 = vadd.f32 %v4922_v47, %v4712_v14  ;;  %v4925_v19 = vadd.f32 %v4924_v18, %v4923_v33  ;;  %v4947_v59 = vadd.f32 %v4946_v24, %v4945_v16 }
 0x9f6   : > { %v4012_v34 = vadd.f32 %v4944_v48, %v3971_v22  ;;  %v3974_v60 = vadd.f32 %v4925_v19, %v4712_v14 }
 0x9f8   : > { %v4015_v28 = vadd.f32 %v4947_v59, %v3974_v60 }
 0xa10   : > { %v4964_v29 = vpop.f32.mrb[60].mxu0  ;;  %v4986_v21 = vpop.f32.mrb[60].mxu1 }
 0xa11   : > { %v4965_v30 = vpop.f32.mrb[61].mxu0  ;;  %v4987_v32 = vpop.f32.mrb[61].mxu1 }
 0xa12   : > { %v4966_v35 = vadd.f32 %v4965_v30, %v4964_v29  ;;  %v4988_v36 = vadd.f32 %v4987_v32, %v4986_v21  ;;  %v4967_v23 = vpop.f32.mrb[62].mxu0  ;;  %v4989_v37 = vpop.f32.mrb[62].mxu1 }
 0xa13   : > { %v4968_v38 = vpop.f32.mrb[63].mxu0  ;;  %v4990_v39 = vpop.f32.mrb[63].mxu1 }
 0xa14   : > { %v4053_v40 = vadd.f32 %v4966_v35, %v4012_v34  ;;  %v4969_v41 = vadd.f32 %v4968_v38, %v4967_v23  ;;  %v4991_v25 = vadd.f32 %v4990_v39, %v4989_v37  ;;  %v4842_v38 = vld [vmem:[%s924_s23] ss:$0 sm:$0xff] }
 0xa16   : > { %v4094_v42 = vadd.f32 %v4988_v36, %v4053_v40  ;;  %v4056_v43 = vadd.f32 %v4969_v41, %v4015_v28  ;;  %v4841_v36 = vld [vmem:[%s921_s0] ss:$0 sm:$0xff] }
 0xa18   : > { %v4097_v44 = vadd.f32 %v4991_v25, %v4056_v43  ;;  %v5464_v43 = vld [vmem:[%s6402_s27] sm:$0xff] (!%p4843_p6)  }
 0xa30   : > { %v5008_v46 = vpop.f32.mrb[64].mxu0 }
 0xa31   : > { %v5030_v26 = vpop.f32.mrb[64].mxu1  ;;  %v5009_v49 = vpop.f32.mrb[65].mxu0 }
 0xa32   : > { %v5010_v50 = vadd.f32 %v5009_v49, %v5008_v46  ;;  %v5031_v45 = vpop.f32.mrb[65].mxu1  ;;  %v5011_v51 = vpop.f32.mrb[66].mxu0  ;;  %v5465_v46 = vld [vmem:[%s6402_s27 + $0x8] sm:$0xff] (!%p4843_p6)   ;;  %v4844_v49 = vld [vmem:[%s6403_s1] ss:$0 sm:$0xff] (!%p4843_p6) }
 0xa33   : > { %v5032_v27 = vadd.f32 %v5031_v45, %v5030_v26  ;;  %v5033_v17 = vpop.f32.mrb[66].mxu1  ;;  %v5012_v52 = vpop.f32.mrb[67].mxu0 }
 0xa34   : > { %v4135_v53 = vadd.f32 %v5010_v50, %v4094_v42  ;;  %v5013_v13 = vadd.f32 %v5012_v52, %v5011_v51  ;;  %v5034_v54 = vpop.f32.mrb[67].mxu1 }
 0xa35   : > { %v5035_v20 = vadd.f32 %v5034_v54, %v5033_v17 }
 0xa36   : > { %v4176_v55 = vadd.f32 %v5032_v27, %v4135_v53  ;;  %v4138_v56 = vadd.f32 %v5013_v13, %v4097_v44  ;;  %v5531_v44 = vmov (!%p4843_p6), 0.0  }
 0xa37   : > { %5217 = vmatprep.subr.bf16.mxu0 (!%p4843_p6), %v5531_v44  ;;  %5221 = vmatprep.mubr.msk.bf16.mxu0 (!%p4843_p6), %vm5532_vm9, %v5531_v44 }
 0xa38   : > { %v4179_v57 = vadd.f32 %v5035_v20, %v4138_v56  ;;  %5218 = vmatpush3.bf16.msra.mxu0 (!%p4843_p6), %v5464_v43 }
 0xa39   : > { %5219 = vmatprep.subr.bf16.mxu0 (!%p4843_p6), %v5531_v44 }
 0xa3c   : > { %5220 = vmatpush3.bf16.msra.mxu0 (!%p4843_p6), %v5465_v46 }
 0xa50   : > { %v5052_v58 = vpop.f32.mrb[68].mxu0 }
 0xa51   : > { %v5074_v61 = vpop.f32.mrb[68].mxu1  ;;  %v5053_v62 = vpop.f32.mrb[69].mxu0 }
 0xa52   : > { %v5054_v63 = vadd.f32 %v5053_v62, %v5052_v58  ;;  %v5075_v0 = vpop.f32.mrb[69].mxu1  ;;  %v5055_v1 = vpop.f32.mrb[70].mxu0 }
 0xa53   : > { %v5076_v2 = vadd.f32 %v5075_v0, %v5074_v61  ;;  %v5077_v4 = vpop.f32.mrb[70].mxu1  ;;  %v5056_v7 = vpop.f32.mrb[71].mxu0 }
 0xa54   : > { %v4217_v3 = vadd.f32 %v5054_v63, %v4176_v55  ;;  %v5057_v8 = vadd.f32 %v5056_v7, %v5055_v1  ;;  %v5078_v9 = vpop.f32.mrb[71].mxu1 }
 0xa55   : > { %v5079_v10 = vadd.f32 %v5078_v9, %v5077_v4 }
 0xa56   : > { %v4258_v11 = vadd.f32 %v5076_v2, %v4217_v3  ;;  %v4220_v12 = vadd.f32 %v5057_v8, %v4179_v57 }
 0xa58   : > { %v4261_v14 = vadd.f32 %v5079_v10, %v4220_v12  ;;  %v4264_v15 = vadd.f32 %v4258_v11, %v6008_v5 }
 0xa5a   : > { %v4268_v31 = vsel %vm1023_vm4, %v4264_v15, 0.0  ;;  %v4265_v47 = vadd.f32 %v4261_v14, %v6010_v6 }
 0xa5b   : > { %4269 = vadd.xlane.f32.xlu0 %v4268_v31 }
 0xa5c   : > { %v4271_v48 = vsel %vm1023_vm4, %v4265_v47, 0.0 }
 0xa5d   : > { %4272 = vadd.xlane.f32.xlu1 %v4271_v48 }
 0xae8   : > { %v4270_v33 = vpop.xlane.xlu0 %4269 }
 0xae9   : > { %v4274_v16 = vmul.f32 0.03125, %v4270_v33 }
 0xaea   : > { %v4273_v18 = vpop.xlane.xlu1 %4272 }
 0xaeb   : > { %v4276_v24 = vsub.f32 %v4264_v15, %v4274_v16  ;;  %v4275_v22 = vmul.f32 0.03125, %v4273_v18 }
 0xaed   : > { %v4277_v19 = vsub.f32 %v4265_v47, %v4275_v22  ;;  %v4278_v59 = vmul.f32 %v4276_v24, %v4276_v24 }
 0xaef   : > { %v4280_v34 = vsel %vm1023_vm4, %v4278_v59, 0.0  ;;  %v4279_v60 = vmul.f32 %v4277_v19, %v4277_v19 }
 0xaf0   : > { %4281 = vadd.xlane.f32.xlu0 %v4280_v34 }
 0xaf1   : > { %v4283_v5 = vsel %vm1023_vm4, %v4279_v60, 0.0 }
 0xaf2   : > { %4284 = vadd.xlane.f32.xlu1 %v4283_v5 }
 0xb7d   : > { %v4282_v6 = vpop.xlane.xlu0 %4281 }
 0xb7e   : > { %v4286_v28 = vmul.f32 0.03125, %v4282_v6 }
 0xb7f   : > { %v4285_v29 = vpop.xlane.xlu1 %4284 }
 0xb80   : > { %v4288_v21 = vadd.f32 1e-05, %v4286_v28  ;;  %v4287_v30 = vmul.f32 0.03125, %v4285_v29 }
 0xb82   : > { %5458 = vrsqrt.f32 %v4288_v21  ;;  %v4289_v32 = vadd.f32 1e-05, %v4287_v30 }
 0xb84   : > { %5460 = vrsqrt.f32 %v4289_v32 }
 0xb8c   : > { %v5459_v35 = vpop.eup %5458 }
 0xb8d   : > { %v4292_v23 = vmul.f32 %v5459_v35, %v4276_v24 }
 0xb8e   : > { %v5461_v37 = vpop.eup %5460 }
 0xb8f   : > { %v4300_v39 = vmul.f32 %v4841_v36, %v4292_v23  ;;  %v4293_v40 = vmul.f32 %v5461_v37, %v4277_v19  ;;  %4315 = sbr.rel (%p4843_p6) target bundleno = 3184 (0xc70), region = 112 }
 0xb91   : > { %v4308_v41 = vadd.f32 %v4842_v38, %v4300_v39  ;;  %v4301_v25 = vmul.f32 %v4841_v36, %v4293_v40 }
 0xb93   : > { %4310 = vst.msk [vmem:[#allocation2] sm:$0xff] %vm1023_vm4, %v4308_v41  ;;  %v4309_v42 = vadd.f32 %v4842_v38, %v4301_v25 }
 0xb95   : > { %4311 = vst.msk [vmem:[#allocation2 + $0x8] sm:$0xff] %vm1023_vm4, %v4309_v42  ;;  %v4320_v26 = vpack.c.bf16 (!%p4843_p6), %v4309_v42, %v4308_v41 }
 0xb97   : > { %5222 = vmatmul.mubr.msk.bf16.vlgmr.msra.gmra.mrb[0].mxu0 %vm1023_vm4, %v4320_v26 }
 0xc6a   : > { %v4377_v50 = vpop.f32.mrb[0].mxu0 }
 0xc6b   : > { %v4378_v45 = vadd.f32 %v4844_v49, %v4377_v50  ;;  %v5223_v51 = vpop.f32.mrb[1].mxu0 }
 0xc6c   : > { %v4380_v27 = vpop.f32.mrb[2].mxu0 }
 0xc6d   : > { %4384 = vst.msk [vmem:[#allocation3] sm:$0xff] %vm1655_vm7, %v4378_v45  ;;  %v4381_v17 = vadd.f32 %v4844_v49, %v4380_v27  ;;  %v5224_v52 = vpop.f32.mrb[3].mxu0 }
 0xc6f   : > { %4385 = vst.msk [vmem:[#allocation3 + $0x8] sm:$0xff] %vm1655_vm7, %v4381_v17 }
 0xc70 PF: > { %s6404_s5 = sld [smem:[#allocation8_spill]]  ;;  %s5533_s26 = smov [#allocation3]  }
 0xc71   : > { %s4395_s7 = sshll.u32 %s5533_s26, 4  ;;  %s4396_s7 = int_to_ptr.vmem [resolvable:$true] %s4395_s7 }
 0xc72   : > { %s5466_s9 = scalar_lea.vmem %s4396_s7, 256  ;;  %p5473_p11 = scmp.lt.s32.totalorder %s4396_s7, %s4396_s7 }
 0xc73   : > { %p5467_p8 = scmp.ne.s32.totalorder %s4396_s7, %s5466_s9  ;;  %p5474_p12 = scmp.lt.s32.totalorder %s5466_s9, %s5466_s9 }
 0xc75   : > { %p5475_p13 = por %p5474_p12, %p5473_p11 }
 0xc76   : > { %s6405_s19 = sadd.s32 4294967295, %s6404_s5  }
 0xc77   : > { %p6296_p7 = scmp.eq.s32.totalorder %s6405_s19, 3 }
 0xc79   : > { %p5468_p9 = pnand %p5467_p8, %p6296_p7 }
 0xc7b   : > { %p5469_p10 = pneg %p5468_p9 }
 0xc7d   : > { %p5476_p0 = pnand %p5475_p13, %p5469_p10 }
 0xc7f   : > { %5479 = shalt.err (!%p5476_p0)
}
 0xc80   : > { %s6407_s18 = sld [smem:[#allocation24_spill]] }
 0xc86   : > { %s5480_s13 = scalar_lea.hbm %s6407_s18, 256 }
 0xc87   : > { %p5481_p1 = scmp.ne.s32.totalorder %s6407_s18, %s5480_s13  ;;  %p5486_p4 = scmp.lt.u32.totalorder %s5480_s13, %s6407_s18 }
 0xc89   : > { %p5482_p2 = pnand %p5481_p1, %p6296_p7 }
 0xc8b   : > { %p5483_p3 = pneg %p5482_p2 }
 0xc8d   : > { %p5488_p5 = pnand %p5486_p4, %p5483_p3 }
 0xc8f   : > { %5491 = shalt.err (!%p5488_p5)
}
 0xc90   : > { %s5534_s4 = smov 128  }
 0xc91   : > { %5226 = dma.vmem_to_hbm [thread:$0]  (%p6296_p7), %s4396_s7, 256, %s6407_s18, [#allocation4], %s5534_s4, %s5534_s4, %s5527_s21  }
 0xc92   : > { %5505 = dma.done.wait (%p6296_p7), [#allocation4], 256  }
 0xc93   : > { %5507 = vsyncadd (%p6296_p7), [#allocation4], 4294967040 }
 0xc94 PF: > { %s6408_s30 = sld [smem:[#allocation8_spill]]  ;;  %s6409_s2 = sld [smem:[#allocation7_spill]] }
 0xc95   : > { %s6410_s25 = sld [smem:[#allocation9_spill]] }
 0xc9a   : > { %s32_s26 = sadd.s32 1, %s6408_s30  }
 0xc9b   : > { %p29_p6 = scmp.ge.s32.totalorder %s32_s26, 6  }
 0xc9d   :  { %31 = sbr.rel (!%p29_p6) target bundleno = 17 (0x11), region = 188 }
 0xca4   :  { %4411 = vsyncpa [#allocation4], 1 }
 0xca5   :  { %4413 = vsyncpa [#allocation4 + $0x1], 1 }

</bundles_post_ra>
